<compile_context>
chip_gen: v7x
topology: tpu7x:2x2x1
jax: 0.10.0
libtpu: 0.0.40
codegen_flags: <defaults>
</compile_context>

<pallas_src>
import jax
import jax.numpy as jnp
from jax.experimental import pallas as pl
from jax.experimental.pallas import tpu as pltpu

D_MODEL = 32
FF_HSIZE = 64
N_HEAD = 4
HEAD_DIM = D_MODEL // N_HEAD
KERNEL_SIZE = 3
LN_EPS = 1e-5
BN_EPS = 1e-5


def _layernorm(x, g, b):
    mean = jnp.mean(x, axis=-1, keepdims=True)
    var = jnp.mean(jnp.square(x - mean), axis=-1, keepdims=True)
    return (x - mean) * jax.lax.rsqrt(var + LN_EPS) * g + b


# ----------------------------- fused module bodies ------------------------------------

def _ff_half(x, g, b, w1, b1, w2, b2):
    xn = _layernorm(x, g, b)
    h = jnp.dot(xn, w1, preferred_element_type=jnp.float32) + b1
    h = h * jax.nn.sigmoid(h)                                          # Swish
    # TODO(synk): dropout is identity at inference (eval mode)
    return x + 0.5 * (jnp.dot(h, w2, preferred_element_type=jnp.float32) + b2)


def _mha(x, g, b, wq, bq, wk, bk, wv, bv, wo, bo):
    L = x.shape[0]
    xn = _layernorm(x, g, b)
    q = jnp.dot(xn, wq, preferred_element_type=jnp.float32) + bq
    k = jnp.dot(xn, wk, preferred_element_type=jnp.float32) + bk
    v = jnp.dot(xn, wv, preferred_element_type=jnp.float32) + bv
    scale = 1.0 / (HEAD_DIM ** 0.5)
    # Per-head attention without lane slicing / concat: mask the head's lanes on
    # q and v (zeros outside the head), keep every operand at full (L, D) width,
    # and accumulate per-head outputs directly into the full-width result.
    lane = jax.lax.broadcasted_iota(jnp.int32, (L, D_MODEL), 1)
    attn = jnp.zeros((L, D_MODEL), jnp.float32)
    for h in range(N_HEAD):
        m = (lane >= h * HEAD_DIM) & (lane < (h + 1) * HEAD_DIM)
        qm = jnp.where(m, q, 0.0)
        vm = jnp.where(m, v, 0.0)
        s = jax.lax.dot_general(qm, k, (((1,), (1,)), ((), ())),
                                preferred_element_type=jnp.float32) * scale  # (L, L)
        s = s - jnp.max(s, axis=-1, keepdims=True)
        e = jnp.exp(s)
        p = e * pl.reciprocal(jnp.sum(e, axis=-1, keepdims=True), approx=True)
        attn = attn + jnp.dot(p, vm, preferred_element_type=jnp.float32)
    y = jnp.dot(attn, wo, preferred_element_type=jnp.float32) + bo
    # TODO(synk): dropout is identity at inference (eval mode)
    return x + y


def _conv(x, g, b, pw1_wa, pw1_wg, pw1_ba, pw1_bg, dw_w, dw_b,
          bn_g, bn_b, bn_m, bn_v, pw2_w, pw2_b):
    L = x.shape[0]
    xn = _layernorm(x, g, b)
    # pointwise conv (1x1) + GLU; the 2*D weight is pre-split in the wrapper so
    # there is no lane-axis slice of the (L, 2D) intermediate in-kernel.
    a = jnp.dot(xn, pw1_wa, preferred_element_type=jnp.float32) + pw1_ba
    gate = jnp.dot(xn, pw1_wg, preferred_element_type=jnp.float32) + pw1_bg
    h = a * jax.nn.sigmoid(gate)                                       # GLU
    # depthwise conv along time (kernel_size=3, 'same' padding, cross-correlation).
    # Taps unrolled; iota hoisted; only the two edge taps need a boundary mask.
    # jnp.roll with a static shift lowers to a sublane rotate (XLU).
    t = jax.lax.broadcasted_iota(jnp.int32, (L, D_MODEL), 0)
    h_prev = jnp.where(t >= 1, jnp.roll(h, 1, axis=0), 0.0)            # h[i-1]
    h_next = jnp.where(t <= L - 2, jnp.roll(h, -1, axis=0), 0.0)       # h[i+1]
    hc = h_prev * dw_w[0:1, :] + h * dw_w[1:2, :] + h_next * dw_w[2:3, :] + dw_b
    # BatchNorm1d (eval mode, running stats)
    hb = (hc - bn_m) * jax.lax.rsqrt(bn_v + BN_EPS) * bn_g + bn_b
    hs = hb * jax.nn.sigmoid(hb)                                       # Swish
    y = jnp.dot(hs, pw2_w, preferred_element_type=jnp.float32) + pw2_b
    # TODO(synk): dropout is identity at inference (eval mode)
    return x + y


# --------------------------------- fused kernel ---------------------------------------

def conformer_kernel(
    x_ref,
    # ff1
    f1_g_ref, f1_b_ref, f1_w1_ref, f1_b1_ref, f1_w2_ref, f1_b2_ref,
    # mha
    m_g_ref, m_b_ref, wq_ref, bq_ref, wk_ref, bk_ref, wv_ref, bv_ref, wo_ref, bo_ref,
    # conv
    c_g_ref, c_b_ref, pw1_wa_ref, pw1_wg_ref, pw1_ba_ref, pw1_bg_ref,
    dw_w_ref, dw_b_ref, bn_g_ref, bn_b_ref, bn_m_ref, bn_v_ref, pw2_w_ref, pw2_b_ref,
    # ff2
    f2_g_ref, f2_b_ref, f2_w1_ref, f2_b1_ref, f2_w2_ref, f2_b2_ref,
    o_ref,
):
    x = x_ref[0]                                                       # (L, D)
    x = _ff_half(x, f1_g_ref[...], f1_b_ref[...],
                 f1_w1_ref[...], f1_b1_ref[...], f1_w2_ref[...], f1_b2_ref[...])
    x = _mha(x, m_g_ref[...], m_b_ref[...],
             wq_ref[...], bq_ref[...], wk_ref[...], bk_ref[...],
             wv_ref[...], bv_ref[...], wo_ref[...], bo_ref[...])
    x = _conv(x, c_g_ref[...], c_b_ref[...],
              pw1_wa_ref[...], pw1_wg_ref[...], pw1_ba_ref[...], pw1_bg_ref[...],
              dw_w_ref[...], dw_b_ref[...],
              bn_g_ref[...], bn_b_ref[...], bn_m_ref[...], bn_v_ref[...],
              pw2_w_ref[...], pw2_b_ref[...])
    x = _ff_half(x, f2_g_ref[...], f2_b_ref[...],
                 f2_w1_ref[...], f2_b1_ref[...], f2_w2_ref[...], f2_b2_ref[...])
    o_ref[0] = x.astype(o_ref.dtype)


# ------------------------------------ wrapper ------------------------------------------

def _const_spec(arr):
    # full-array block whose block index never changes -> DMA'd once across the grid
    zeros = (0,) * arr.ndim
    return pl.BlockSpec(arr.shape, lambda b, _z=zeros: _z)


def conformer_pallas(x, params):
    B, L, D = x.shape
    ff1, mha, conv, ff2 = params["ff1"], params["mha"], params["conv"], params["ff2"]
    weights = (
        # ff1
        ff1["ln_g"], ff1["ln_b"], ff1["w1"], ff1["b1"], ff1["w2"], ff1["b2"],
        # mha
        mha["ln_g"], mha["ln_b"], mha["wq"], mha["bq"], mha["wk"], mha["bk"],
        mha["wv"], mha["bv"], mha["wo"], mha["bo"],
        # conv (GLU weight/bias pre-split outside the kernel)
        conv["ln_g"], conv["ln_b"],
        conv["pw1_w"][:, :D_MODEL], conv["pw1_w"][:, D_MODEL:],
        conv["pw1_b"][:, :D_MODEL], conv["pw1_b"][:, D_MODEL:],
        conv["dw_w"], conv["dw_b"],
        conv["bn_g"], conv["bn_b"], conv["bn_m"], conv["bn_v"],
        conv["pw2_w"], conv["pw2_b"],
        # ff2
        ff2["ln_g"], ff2["ln_b"], ff2["w1"], ff2["b1"], ff2["w2"], ff2["b2"],
    )
    act_spec = pl.BlockSpec((1, L, D), lambda b: (b, 0, 0))
    return pl.pallas_call(
        conformer_kernel,
        out_shape=jax.ShapeDtypeStruct((B, L, D), x.dtype),
        grid=(B,),
        in_specs=[act_spec] + [_const_spec(w) for w in weights],
        out_specs=act_spec,
        compiler_params=pltpu.CompilerParams(dimension_semantics=("parallel",)),
    )(x, *weights)


# ---------------------------- deterministic param init --------------------------------

def init_params(key):
    keys = iter(jax.random.split(key, 40))

    def w(shape, scale=0.05):
        return (scale * jax.random.normal(next(keys), shape)).astype(jnp.float32)

    ones = jnp.ones((1, D_MODEL), jnp.float32)
    zeros = jnp.zeros((1, D_MODEL), jnp.float32)

    def ff_params():
        return dict(ln_g=ones, ln_b=zeros,
                    w1=w((D_MODEL, FF_HSIZE)), b1=w((1, FF_HSIZE)),
                    w2=w((FF_HSIZE, D_MODEL)), b2=w((1, D_MODEL)))

    mha = dict(ln_g=ones, ln_b=zeros,
               wq=w((D_MODEL, D_MODEL)), bq=w((1, D_MODEL)),
               wk=w((D_MODEL, D_MODEL)), bk=w((1, D_MODEL)),
               wv=w((D_MODEL, D_MODEL)), bv=w((1, D_MODEL)),
               wo=w((D_MODEL, D_MODEL)), bo=w((1, D_MODEL)))
    conv = dict(ln_g=ones, ln_b=zeros,
                pw1_w=w((D_MODEL, 2 * D_MODEL)), pw1_b=w((1, 2 * D_MODEL)),
                dw_w=w((KERNEL_SIZE, D_MODEL)), dw_b=w((1, D_MODEL)),
                bn_g=ones, bn_b=zeros, bn_m=zeros, bn_v=jnp.ones((1, D_MODEL), jnp.float32),
                pw2_w=w((D_MODEL, D_MODEL)), pw2_b=w((1, D_MODEL)))
    return dict(ff1=ff_params(), mha=mha, conv=conv, ff2=ff_params())


# ------------------------------- pure-JAX reference -----------------------------------

def conformer_ref(x, params):
    def ln(x, g, b):
        m = x.mean(-1, keepdims=True)
        v = jnp.square(x - m).mean(-1, keepdims=True)
        return (x - m) / jnp.sqrt(v + LN_EPS) * g + b

    def ff(x, p):
        xn = ln(x, p["ln_g"], p["ln_b"])
        h = xn @ p["w1"] + p["b1"]
        h = h * jax.nn.sigmoid(h)
        return x + 0.5 * (h @ p["w2"] + p["b2"])

    def mha(x, p):
        B, L, D = x.shape
        xn = ln(x, p["ln_g"], p["ln_b"])
        q = xn @ p["wq"] + p["bq"]
        k = xn @ p["wk"] + p["bk"]
        v = xn @ p["wv"] + p["bv"]
        split = lambda t: t.reshape(B, L, N_HEAD, HEAD_DIM).transpose(0, 2, 1, 3)
        qh, kh, vh = split(q), split(k), split(v)
        s = jnp.einsum("bhld,bhmd->bhlm", qh, kh) / jnp.sqrt(HEAD_DIM)
        a = jax.nn.softmax(s, axis=-1)
        o = jnp.einsum("bhlm,bhmd->bhld", a, vh).transpose(0, 2, 1, 3).reshape(B, L, D)
        return x + o @ p["wo"] + p["bo"]

    def conv(x, p):
        B, L, D = x.shape
        xn = ln(x, p["ln_g"], p["ln_b"])
        h = xn @ p["pw1_w"] + p["pw1_b"]
        a, g = h[..., :D_MODEL], h[..., D_MODEL:]
        h = a * jax.nn.sigmoid(g)
        pad = (KERNEL_SIZE - 1) // 2
        hp = jnp.pad(h, ((0, 0), (pad, pad), (0, 0)))
        acc = sum(hp[:, kk:kk + L, :] * p["dw_w"][kk] for kk in range(KERNEL_SIZE))
        h = acc + p["dw_b"]
        h = (h - p["bn_m"]) / jnp.sqrt(p["bn_v"] + BN_EPS) * p["bn_g"] + p["bn_b"]
        h = h * jax.nn.sigmoid(h)
        return x + h @ p["pw2_w"] + p["pw2_b"]

    x = ff(x, params["ff1"])
    x = mha(x, params["mha"])
    x = conv(x, params["conv"])
    x = ff(x, params["ff2"])
    return x


if __name__ == "__main__":
    key = jax.random.PRNGKey(0)
    k_x, k_p = jax.random.split(key)
    B, L = 2, 8
    x = jax.random.normal(k_x, (B, L, D_MODEL), dtype=jnp.float32)
    params = init_params(k_p)

    out = jax.jit(conformer_pallas)(x, params)
    out = jax.block_until_ready(out)

    ref = conformer_ref(x, params)
    assert out.shape == (B, L, D_MODEL)
    # slightly relaxed vs. exact-division softmax because of approx EUP reciprocal
    assert jnp.allclose(out, ref, atol=2e-3, rtol=2e-3), float(jnp.max(jnp.abs(out - ref)))
    print("KERNEL_OK")
</pallas_src>

<mosaic_0001>
module attributes {stable_mosaic.version = 11 : i64} {
  func.func @conformer_kernel(%arg0: i32, %arg1: memref<1x8x32xf32, #tpu.memory_space<vmem>>, %arg2: memref<1x32xf32, #tpu.memory_space<vmem>>, %arg3: memref<1x32xf32, #tpu.memory_space<vmem>>, %arg4: memref<32x64xf32, #tpu.memory_space<vmem>>, %arg5: memref<1x64xf32, #tpu.memory_space<vmem>>, %arg6: memref<64x32xf32, #tpu.memory_space<vmem>>, %arg7: memref<1x32xf32, #tpu.memory_space<vmem>>, %arg8: memref<1x32xf32, #tpu.memory_space<vmem>>, %arg9: memref<1x32xf32, #tpu.memory_space<vmem>>, %arg10: memref<32x32xf32, #tpu.memory_space<vmem>>, %arg11: memref<1x32xf32, #tpu.memory_space<vmem>>, %arg12: memref<32x32xf32, #tpu.memory_space<vmem>>, %arg13: memref<1x32xf32, #tpu.memory_space<vmem>>, %arg14: memref<32x32xf32, #tpu.memory_space<vmem>>, %arg15: memref<1x32xf32, #tpu.memory_space<vmem>>, %arg16: memref<32x32xf32, #tpu.memory_space<vmem>>, %arg17: memref<1x32xf32, #tpu.memory_space<vmem>>, %arg18: memref<1x32xf32, #tpu.memory_space<vmem>>, %arg19: memref<1x32xf32, #tpu.memory_space<vmem>>, %arg20: memref<32x32xf32, #tpu.memory_space<vmem>>, %arg21: memref<32x32xf32, #tpu.memory_space<vmem>>, %arg22: memref<1x32xf32, #tpu.memory_space<vmem>>, %arg23: memref<1x32xf32, #tpu.memory_space<vmem>>, %arg24: memref<3x32xf32, #tpu.memory_space<vmem>>, %arg25: memref<1x32xf32, #tpu.memory_space<vmem>>, %arg26: memref<1x32xf32, #tpu.memory_space<vmem>>, %arg27: memref<1x32xf32, #tpu.memory_space<vmem>>, %arg28: memref<1x32xf32, #tpu.memory_space<vmem>>, %arg29: memref<1x32xf32, #tpu.memory_space<vmem>>, %arg30: memref<32x32xf32, #tpu.memory_space<vmem>>, %arg31: memref<1x32xf32, #tpu.memory_space<vmem>>, %arg32: memref<1x32xf32, #tpu.memory_space<vmem>>, %arg33: memref<1x32xf32, #tpu.memory_space<vmem>>, %arg34: memref<32x64xf32, #tpu.memory_space<vmem>>, %arg35: memref<1x64xf32, #tpu.memory_space<vmem>>, %arg36: memref<64x32xf32, #tpu.memory_space<vmem>>, %arg37: memref<1x32xf32, #tpu.memory_space<vmem>>, %arg38: memref<1x8x32xf32, #tpu.memory_space<vmem>>) attributes {dimension_semantics = [#tpu.dimension_semantics<parallel>], iteration_bounds = array<i64: 2>, scalar_prefetch = 0 : i64, scratch_operands = 0 : i64, tpu.core_type = #tpu.core_type<tc>, window_params = [{transform_indices = @transform_0, window_bounds = array<i64: 1, 8, 32>}, {pipeline_mode = #tpu.pipeline_mode<synchronous>, transform_indices = @transform_1, window_bounds = array<i64: 1, 32>}, {pipeline_mode = #tpu.pipeline_mode<synchronous>, transform_indices = @transform_2, window_bounds = array<i64: 1, 32>}, {pipeline_mode = #tpu.pipeline_mode<synchronous>, transform_indices = @transform_3, window_bounds = array<i64: 32, 64>}, {pipeline_mode = #tpu.pipeline_mode<synchronous>, transform_indices = @transform_4, window_bounds = array<i64: 1, 64>}, {pipeline_mode = #tpu.pipeline_mode<synchronous>, transform_indices = @transform_5, window_bounds = array<i64: 64, 32>}, {pipeline_mode = #tpu.pipeline_mode<synchronous>, transform_indices = @transform_6, window_bounds = array<i64: 1, 32>}, {pipeline_mode = #tpu.pipeline_mode<synchronous>, transform_indices = @transform_7, window_bounds = array<i64: 1, 32>}, {pipeline_mode = #tpu.pipeline_mode<synchronous>, transform_indices = @transform_8, window_bounds = array<i64: 1, 32>}, {pipeline_mode = #tpu.pipeline_mode<synchronous>, transform_indices = @transform_9, window_bounds = array<i64: 32, 32>}, {pipeline_mode = #tpu.pipeline_mode<synchronous>, transform_indices = @transform_10, window_bounds = array<i64: 1, 32>}, {pipeline_mode = #tpu.pipeline_mode<synchronous>, transform_indices = @transform_11, window_bounds = array<i64: 32, 32>}, {pipeline_mode = #tpu.pipeline_mode<synchronous>, transform_indices = @transform_12, window_bounds = array<i64: 1, 32>}, {pipeline_mode = #tpu.pipeline_mode<synchronous>, transform_indices = @transform_13, window_bounds = array<i64: 32, 32>}, {pipeline_mode = #tpu.pipeline_mode<synchronous>, transform_indices = @transform_14, window_bounds = array<i64: 1, 32>}, {pipeline_mode = #tpu.pipeline_mode<synchronous>, transform_indices = @transform_15, window_bounds = array<i64: 32, 32>}, {pipeline_mode = #tpu.pipeline_mode<synchronous>, transform_indices = @transform_16, window_bounds = array<i64: 1, 32>}, {pipeline_mode = #tpu.pipeline_mode<synchronous>, transform_indices = @transform_17, window_bounds = array<i64: 1, 32>}, {pipeline_mode = #tpu.pipeline_mode<synchronous>, transform_indices = @transform_18, window_bounds = array<i64: 1, 32>}, {pipeline_mode = #tpu.pipeline_mode<synchronous>, transform_indices = @transform_19, window_bounds = array<i64: 32, 32>}, {pipeline_mode = #tpu.pipeline_mode<synchronous>, transform_indices = @transform_20, window_bounds = array<i64: 32, 32>}, {pipeline_mode = #tpu.pipeline_mode<synchronous>, transform_indices = @transform_21, window_bounds = array<i64: 1, 32>}, {pipeline_mode = #tpu.pipeline_mode<synchronous>, transform_indices = @transform_22, window_bounds = array<i64: 1, 32>}, {pipeline_mode = #tpu.pipeline_mode<synchronous>, transform_indices = @transform_23, window_bounds = array<i64: 3, 32>}, {pipeline_mode = #tpu.pipeline_mode<synchronous>, transform_indices = @transform_24, window_bounds = array<i64: 1, 32>}, {pipeline_mode = #tpu.pipeline_mode<synchronous>, transform_indices = @transform_25, window_bounds = array<i64: 1, 32>}, {pipeline_mode = #tpu.pipeline_mode<synchronous>, transform_indices = @transform_26, window_bounds = array<i64: 1, 32>}, {pipeline_mode = #tpu.pipeline_mode<synchronous>, transform_indices = @transform_27, window_bounds = array<i64: 1, 32>}, {pipeline_mode = #tpu.pipeline_mode<synchronous>, transform_indices = @transform_28, window_bounds = array<i64: 1, 32>}, {pipeline_mode = #tpu.pipeline_mode<synchronous>, transform_indices = @transform_29, window_bounds = array<i64: 32, 32>}, {pipeline_mode = #tpu.pipeline_mode<synchronous>, transform_indices = @transform_30, window_bounds = array<i64: 1, 32>}, {pipeline_mode = #tpu.pipeline_mode<synchronous>, transform_indices = @transform_31, window_bounds = array<i64: 1, 32>}, {pipeline_mode = #tpu.pipeline_mode<synchronous>, transform_indices = @transform_32, window_bounds = array<i64: 1, 32>}, {pipeline_mode = #tpu.pipeline_mode<synchronous>, transform_indices = @transform_33, window_bounds = array<i64: 32, 64>}, {pipeline_mode = #tpu.pipeline_mode<synchronous>, transform_indices = @transform_34, window_bounds = array<i64: 1, 64>}, {pipeline_mode = #tpu.pipeline_mode<synchronous>, transform_indices = @transform_35, window_bounds = array<i64: 64, 32>}, {pipeline_mode = #tpu.pipeline_mode<synchronous>, transform_indices = @transform_36, window_bounds = array<i64: 1, 32>}, {transform_indices = @transform_37, window_bounds = array<i64: 1, 8, 32>}]} {
    %c0 = arith.constant 0 : index
    %c0_0 = arith.constant 0 : index
    %c0_1 = arith.constant 0 : index
    %0 = vector.load %arg1[%c0, %c0_0, %c0_1] : memref<1x8x32xf32, #tpu.memory_space<vmem>>, vector<1x8x32xf32>
    %1 = vector.shape_cast %0 : vector<1x8x32xf32> to vector<8x32xf32>
    %c0_2 = arith.constant 0 : index
    %c0_3 = arith.constant 0 : index
    %2 = vector.load %arg2[%c0_2, %c0_3] : memref<1x32xf32, #tpu.memory_space<vmem>>, vector<1x32xf32>
    %c0_4 = arith.constant 0 : index
    %c0_5 = arith.constant 0 : index
    %3 = vector.load %arg3[%c0_4, %c0_5] : memref<1x32xf32, #tpu.memory_space<vmem>>, vector<1x32xf32>
    %c0_6 = arith.constant 0 : index
    %c0_7 = arith.constant 0 : index
    %4 = vector.load %arg4[%c0_6, %c0_7] : memref<32x64xf32, #tpu.memory_space<vmem>>, vector<32x64xf32>
    %c0_8 = arith.constant 0 : index
    %c0_9 = arith.constant 0 : index
    %5 = vector.load %arg5[%c0_8, %c0_9] : memref<1x64xf32, #tpu.memory_space<vmem>>, vector<1x64xf32>
    %c0_10 = arith.constant 0 : index
    %c0_11 = arith.constant 0 : index
    %6 = vector.load %arg6[%c0_10, %c0_11] : memref<64x32xf32, #tpu.memory_space<vmem>>, vector<64x32xf32>
    %c0_12 = arith.constant 0 : index
    %c0_13 = arith.constant 0 : index
    %7 = vector.load %arg7[%c0_12, %c0_13] : memref<1x32xf32, #tpu.memory_space<vmem>>, vector<1x32xf32>
    %cst = arith.constant dense<0.000000e+00> : vector<8xf32>
    %8 = vector.multi_reduction <add>, %1, %cst [1] : vector<8x32xf32> to vector<8xf32>
    %9 = vector.shape_cast %8 : vector<8xf32> to vector<8x1xf32>
    %cst_14 = arith.constant 3.200000e+01 : f32
    %10 = vector.broadcast %cst_14 : f32 to vector<8x1xf32>
    %11 = arith.divf %9, %10 : vector<8x1xf32>
    %12 = vector.broadcast %11 : vector<8x1xf32> to vector<8x32xf32>
    %13 = arith.subf %1, %12 : vector<8x32xf32>
    %14 = arith.mulf %13, %13 : vector<8x32xf32>
    %cst_15 = arith.constant dense<0.000000e+00> : vector<8xf32>
    %15 = vector.multi_reduction <add>, %14, %cst_15 [1] : vector<8x32xf32> to vector<8xf32>
    %16 = vector.shape_cast %15 : vector<8xf32> to vector<8x1xf32>
    %cst_16 = arith.constant 3.200000e+01 : f32
    %17 = vector.broadcast %cst_16 : f32 to vector<8x1xf32>
    %18 = arith.divf %16, %17 : vector<8x1xf32>
    %19 = vector.broadcast %11 : vector<8x1xf32> to vector<8x32xf32>
    %20 = arith.subf %1, %19 : vector<8x32xf32>
    %cst_17 = arith.constant 9.99999974E-6 : f32
    %21 = vector.broadcast %cst_17 : f32 to vector<8x1xf32>
    %22 = arith.addf %18, %21 : vector<8x1xf32>
    %23 = math.rsqrt %22 : vector<8x1xf32>
    %24 = vector.broadcast %23 : vector<8x1xf32> to vector<8x32xf32>
    %25 = arith.mulf %20, %24 : vector<8x32xf32>
    %26 = vector.broadcast %2 : vector<1x32xf32> to vector<8x32xf32>
    %27 = arith.mulf %25, %26 : vector<8x32xf32>
    %28 = vector.broadcast %3 : vector<1x32xf32> to vector<8x32xf32>
    %29 = arith.addf %27, %28 : vector<8x32xf32>
    %cst_18 = arith.constant dense<0.000000e+00> : vector<8x64xf32>
    %30 = tpu.matmul %29, %4, %cst_18 {dimension_numbers = #tpu.dot_dimension_numbers<[1], [0], [0], [1], [0, 0, 1, 1], [], []>} : vector<8x32xf32>, vector<32x64xf32>, vector<8x64xf32> -> vector<8x64xf32>
    %31 = vector.broadcast %5 : vector<1x64xf32> to vector<8x64xf32>
    %32 = arith.addf %30, %31 : vector<8x64xf32>
    %33 = arith.negf %32 : vector<8x64xf32>
    %34 = math.exp %33 : vector<8x64xf32>
    %cst_19 = arith.constant 1.000000e+00 : f32
    %35 = vector.broadcast %cst_19 : f32 to vector<8x64xf32>
    %36 = arith.addf %35, %34 : vector<8x64xf32>
    %37 = arith.divf %35, %36 : vector<8x64xf32>
    %38 = arith.mulf %32, %37 : vector<8x64xf32>
    %cst_20 = arith.constant dense<0.000000e+00> : vector<8x32xf32>
    %39 = tpu.matmul %38, %6, %cst_20 {dimension_numbers = #tpu.dot_dimension_numbers<[1], [0], [0], [1], [0, 0, 1, 1], [], []>} : vector<8x64xf32>, vector<64x32xf32>, vector<8x32xf32> -> vector<8x32xf32>
    %40 = vector.broadcast %7 : vector<1x32xf32> to vector<8x32xf32>
    %41 = arith.addf %39, %40 : vector<8x32xf32>
    %cst_21 = arith.constant 5.000000e-01 : f32
    %42 = vector.broadcast %cst_21 : f32 to vector<8x32xf32>
    %43 = arith.mulf %42, %41 : vector<8x32xf32>
    %44 = arith.addf %1, %43 : vector<8x32xf32>
    %c0_22 = arith.constant 0 : index
    %c0_23 = arith.constant 0 : index
    %45 = vector.load %arg8[%c0_22, %c0_23] : memref<1x32xf32, #tpu.memory_space<vmem>>, vector<1x32xf32>
    %c0_24 = arith.constant 0 : index
    %c0_25 = arith.constant 0 : index
    %46 = vector.load %arg9[%c0_24, %c0_25] : memref<1x32xf32, #tpu.memory_space<vmem>>, vector<1x32xf32>
    %c0_26 = arith.constant 0 : index
    %c0_27 = arith.constant 0 : index
    %47 = vector.load %arg10[%c0_26, %c0_27] : memref<32x32xf32, #tpu.memory_space<vmem>>, vector<32x32xf32>
    %c0_28 = arith.constant 0 : index
    %c0_29 = arith.constant 0 : index
    %48 = vector.load %arg11[%c0_28, %c0_29] : memref<1x32xf32, #tpu.memory_space<vmem>>, vector<1x32xf32>
    %c0_30 = arith.constant 0 : index
    %c0_31 = arith.constant 0 : index
    %49 = vector.load %arg12[%c0_30, %c0_31] : memref<32x32xf32, #tpu.memory_space<vmem>>, vector<32x32xf32>
    %c0_32 = arith.constant 0 : index
    %c0_33 = arith.constant 0 : index
    %50 = vector.load %arg13[%c0_32, %c0_33] : memref<1x32xf32, #tpu.memory_space<vmem>>, vector<1x32xf32>
    %c0_34 = arith.constant 0 : index
    %c0_35 = arith.constant 0 : index
    %51 = vector.load %arg14[%c0_34, %c0_35] : memref<32x32xf32, #tpu.memory_space<vmem>>, vector<32x32xf32>
    %c0_36 = arith.constant 0 : index
    %c0_37 = arith.constant 0 : index
    %52 = vector.load %arg15[%c0_36, %c0_37] : memref<1x32xf32, #tpu.memory_space<vmem>>, vector<1x32xf32>
    %c0_38 = arith.constant 0 : index
    %c0_39 = arith.constant 0 : index
    %53 = vector.load %arg16[%c0_38, %c0_39] : memref<32x32xf32, #tpu.memory_space<vmem>>, vector<32x32xf32>
    %c0_40 = arith.constant 0 : index
    %c0_41 = arith.constant 0 : index
    %54 = vector.load %arg17[%c0_40, %c0_41] : memref<1x32xf32, #tpu.memory_space<vmem>>, vector<1x32xf32>
    %cst_42 = arith.constant dense<0.000000e+00> : vector<8xf32>
    %55 = vector.multi_reduction <add>, %44, %cst_42 [1] : vector<8x32xf32> to vector<8xf32>
    %56 = vector.shape_cast %55 : vector<8xf32> to vector<8x1xf32>
    %cst_43 = arith.constant 3.200000e+01 : f32
    %57 = vector.broadcast %cst_43 : f32 to vector<8x1xf32>
    %58 = arith.divf %56, %57 : vector<8x1xf32>
    %59 = vector.broadcast %58 : vector<8x1xf32> to vector<8x32xf32>
    %60 = arith.subf %44, %59 : vector<8x32xf32>
    %61 = arith.mulf %60, %60 : vector<8x32xf32>
    %cst_44 = arith.constant dense<0.000000e+00> : vector<8xf32>
    %62 = vector.multi_reduction <add>, %61, %cst_44 [1] : vector<8x32xf32> to vector<8xf32>
    %63 = vector.shape_cast %62 : vector<8xf32> to vector<8x1xf32>
    %cst_45 = arith.constant 3.200000e+01 : f32
    %64 = vector.broadcast %cst_45 : f32 to vector<8x1xf32>
    %65 = arith.divf %63, %64 : vector<8x1xf32>
    %66 = vector.broadcast %58 : vector<8x1xf32> to vector<8x32xf32>
    %67 = arith.subf %44, %66 : vector<8x32xf32>
    %cst_46 = arith.constant 9.99999974E-6 : f32
    %68 = vector.broadcast %cst_46 : f32 to vector<8x1xf32>
    %69 = arith.addf %65, %68 : vector<8x1xf32>
    %70 = math.rsqrt %69 : vector<8x1xf32>
    %71 = vector.broadcast %70 : vector<8x1xf32> to vector<8x32xf32>
    %72 = arith.mulf %67, %71 : vector<8x32xf32>
    %73 = vector.broadcast %45 : vector<1x32xf32> to vector<8x32xf32>
    %74 = arith.mulf %72, %73 : vector<8x32xf32>
    %75 = vector.broadcast %46 : vector<1x32xf32> to vector<8x32xf32>
    %76 = arith.addf %74, %75 : vector<8x32xf32>
    %cst_47 = arith.constant dense<0.000000e+00> : vector<8x32xf32>
    %77 = tpu.matmul %76, %47, %cst_47 {dimension_numbers = #tpu.dot_dimension_numbers<[1], [0], [0], [1], [0, 0, 1, 1], [], []>} : vector<8x32xf32>, vector<32x32xf32>, vector<8x32xf32> -> vector<8x32xf32>
    %78 = vector.broadcast %48 : vector<1x32xf32> to vector<8x32xf32>
    %79 = arith.addf %77, %78 : vector<8x32xf32>
    %cst_48 = arith.constant dense<0.000000e+00> : vector<8x32xf32>
    %80 = tpu.matmul %76, %49, %cst_48 {dimension_numbers = #tpu.dot_dimension_numbers<[1], [0], [0], [1], [0, 0, 1, 1], [], []>} : vector<8x32xf32>, vector<32x32xf32>, vector<8x32xf32> -> vector<8x32xf32>
    %81 = vector.broadcast %50 : vector<1x32xf32> to vector<8x32xf32>
    %82 = arith.addf %80, %81 : vector<8x32xf32>
    %cst_49 = arith.constant dense<0.000000e+00> : vector<8x32xf32>
    %83 = tpu.matmul %76, %51, %cst_49 {dimension_numbers = #tpu.dot_dimension_numbers<[1], [0], [0], [1], [0, 0, 1, 1], [], []>} : vector<8x32xf32>, vector<32x32xf32>, vector<8x32xf32> -> vector<8x32xf32>
    %84 = vector.broadcast %52 : vector<1x32xf32> to vector<8x32xf32>
    %85 = arith.addf %83, %84 : vector<8x32xf32>
    %86 = tpu.iota {dimensions = array<i32: 1>} : vector<8x32xi32>
    %cst_50 = arith.constant 0.000000e+00 : f32
    %87 = vector.broadcast %cst_50 : f32 to vector<8x32xf32>
    %c0_i32 = arith.constant 0 : i32
    %88 = vector.broadcast %c0_i32 : i32 to vector<8x32xi32>
    %89 = arith.cmpi sge, %86, %88 : vector<8x32xi32>
    %c8_i32 = arith.constant 8 : i32
    %90 = vector.broadcast %c8_i32 : i32 to vector<8x32xi32>
    %91 = arith.cmpi slt, %86, %90 : vector<8x32xi32>
    %92 = arith.andi %89, %91 : vector<8x32xi1>
    %cst_51 = arith.constant 0.000000e+00 : f32
    %93 = vector.broadcast %cst_51 : f32 to vector<8x32xf32>
    %94 = arith.select %92, %79, %93 : vector<8x32xi1>, vector<8x32xf32>
    %cst_52 = arith.constant 0.000000e+00 : f32
    %95 = vector.broadcast %cst_52 : f32 to vector<8x32xf32>
    %96 = arith.select %92, %85, %95 : vector<8x32xi1>, vector<8x32xf32>
    %cst_53 = arith.constant dense<0.000000e+00> : vector<8x8xf32>
    %97 = tpu.matmul %94, %82, %cst_53 {dimension_numbers = #tpu.dot_dimension_numbers<[1], [1], [0], [0], [0, 0, 1, 0], [], []>} : vector<8x32xf32>, vector<8x32xf32>, vector<8x8xf32> -> vector<8x8xf32>
    %cst_54 = arith.constant 0.353553385 : f32
    %98 = vector.broadcast %cst_54 : f32 to vector<8x8xf32>
    %99 = arith.mulf %97, %98 : vector<8x8xf32>
    %cst_55 = arith.constant dense<0xFF800000> : vector<8xf32>
    %100 = vector.multi_reduction <maximumf>, %99, %cst_55 [1] : vector<8x8xf32> to vector<8xf32>
    %101 = vector.shape_cast %100 : vector<8xf32> to vector<8x1xf32>
    %102 = vector.broadcast %101 : vector<8x1xf32> to vector<8x8xf32>
    %103 = arith.subf %99, %102 : vector<8x8xf32>
    %104 = math.exp %103 : vector<8x8xf32>
    %cst_56 = arith.constant dense<0.000000e+00> : vector<8xf32>
    %105 = vector.multi_reduction <add>, %104, %cst_56 [1] : vector<8x8xf32> to vector<8xf32>
    %106 = vector.shape_cast %105 : vector<8xf32> to vector<8x1xf32>
    %107 = tpu.reciprocal %106 {approx = true} : vector<8x1xf32> -> vector<8x1xf32>
    %108 = vector.broadcast %107 : vector<8x1xf32> to vector<8x8xf32>
    %109 = arith.mulf %104, %108 : vector<8x8xf32>
    %cst_57 = arith.constant dense<0.000000e+00> : vector<8x32xf32>
    %110 = tpu.matmul %109, %96, %cst_57 {dimension_numbers = #tpu.dot_dimension_numbers<[1], [0], [0], [1], [0, 0, 1, 1], [], []>} : vector<8x8xf32>, vector<8x32xf32>, vector<8x32xf32> -> vector<8x32xf32>
    %111 = arith.addf %87, %110 : vector<8x32xf32>
    %c8_i32_58 = arith.constant 8 : i32
    %112 = vector.broadcast %c8_i32_58 : i32 to vector<8x32xi32>
    %113 = arith.cmpi sge, %86, %112 : vector<8x32xi32>
    %c16_i32 = arith.constant 16 : i32
    %114 = vector.broadcast %c16_i32 : i32 to vector<8x32xi32>
    %115 = arith.cmpi slt, %86, %114 : vector<8x32xi32>
    %116 = arith.andi %113, %115 : vector<8x32xi1>
    %cst_59 = arith.constant 0.000000e+00 : f32
    %117 = vector.broadcast %cst_59 : f32 to vector<8x32xf32>
    %118 = arith.select %116, %79, %117 : vector<8x32xi1>, vector<8x32xf32>
    %cst_60 = arith.constant 0.000000e+00 : f32
    %119 = vector.broadcast %cst_60 : f32 to vector<8x32xf32>
    %120 = arith.select %116, %85, %119 : vector<8x32xi1>, vector<8x32xf32>
    %cst_61 = arith.constant dense<0.000000e+00> : vector<8x8xf32>
    %121 = tpu.matmul %118, %82, %cst_61 {dimension_numbers = #tpu.dot_dimension_numbers<[1], [1], [0], [0], [0, 0, 1, 0], [], []>} : vector<8x32xf32>, vector<8x32xf32>, vector<8x8xf32> -> vector<8x8xf32>
    %cst_62 = arith.constant 0.353553385 : f32
    %122 = vector.broadcast %cst_62 : f32 to vector<8x8xf32>
    %123 = arith.mulf %121, %122 : vector<8x8xf32>
    %cst_63 = arith.constant dense<0xFF800000> : vector<8xf32>
    %124 = vector.multi_reduction <maximumf>, %123, %cst_63 [1] : vector<8x8xf32> to vector<8xf32>
    %125 = vector.shape_cast %124 : vector<8xf32> to vector<8x1xf32>
    %126 = vector.broadcast %125 : vector<8x1xf32> to vector<8x8xf32>
    %127 = arith.subf %123, %126 : vector<8x8xf32>
    %128 = math.exp %127 : vector<8x8xf32>
    %cst_64 = arith.constant dense<0.000000e+00> : vector<8xf32>
    %129 = vector.multi_reduction <add>, %128, %cst_64 [1] : vector<8x8xf32> to vector<8xf32>
    %130 = vector.shape_cast %129 : vector<8xf32> to vector<8x1xf32>
    %131 = tpu.reciprocal %130 {approx = true} : vector<8x1xf32> -> vector<8x1xf32>
    %132 = vector.broadcast %131 : vector<8x1xf32> to vector<8x8xf32>
    %133 = arith.mulf %128, %132 : vector<8x8xf32>
    %cst_65 = arith.constant dense<0.000000e+00> : vector<8x32xf32>
    %134 = tpu.matmul %133, %120, %cst_65 {dimension_numbers = #tpu.dot_dimension_numbers<[1], [0], [0], [1], [0, 0, 1, 1], [], []>} : vector<8x8xf32>, vector<8x32xf32>, vector<8x32xf32> -> vector<8x32xf32>
    %135 = arith.addf %111, %134 : vector<8x32xf32>
    %c16_i32_66 = arith.constant 16 : i32
    %136 = vector.broadcast %c16_i32_66 : i32 to vector<8x32xi32>
    %137 = arith.cmpi sge, %86, %136 : vector<8x32xi32>
    %c24_i32 = arith.constant 24 : i32
    %138 = vector.broadcast %c24_i32 : i32 to vector<8x32xi32>
    %139 = arith.cmpi slt, %86, %138 : vector<8x32xi32>
    %140 = arith.andi %137, %139 : vector<8x32xi1>
    %cst_67 = arith.constant 0.000000e+00 : f32
    %141 = vector.broadcast %cst_67 : f32 to vector<8x32xf32>
    %142 = arith.select %140, %79, %141 : vector<8x32xi1>, vector<8x32xf32>
    %cst_68 = arith.constant 0.000000e+00 : f32
    %143 = vector.broadcast %cst_68 : f32 to vector<8x32xf32>
    %144 = arith.select %140, %85, %143 : vector<8x32xi1>, vector<8x32xf32>
    %cst_69 = arith.constant dense<0.000000e+00> : vector<8x8xf32>
    %145 = tpu.matmul %142, %82, %cst_69 {dimension_numbers = #tpu.dot_dimension_numbers<[1], [1], [0], [0], [0, 0, 1, 0], [], []>} : vector<8x32xf32>, vector<8x32xf32>, vector<8x8xf32> -> vector<8x8xf32>
    %cst_70 = arith.constant 0.353553385 : f32
    %146 = vector.broadcast %cst_70 : f32 to vector<8x8xf32>
    %147 = arith.mulf %145, %146 : vector<8x8xf32>
    %cst_71 = arith.constant dense<0xFF800000> : vector<8xf32>
    %148 = vector.multi_reduction <maximumf>, %147, %cst_71 [1] : vector<8x8xf32> to vector<8xf32>
    %149 = vector.shape_cast %148 : vector<8xf32> to vector<8x1xf32>
    %150 = vector.broadcast %149 : vector<8x1xf32> to vector<8x8xf32>
    %151 = arith.subf %147, %150 : vector<8x8xf32>
    %152 = math.exp %151 : vector<8x8xf32>
    %cst_72 = arith.constant dense<0.000000e+00> : vector<8xf32>
    %153 = vector.multi_reduction <add>, %152, %cst_72 [1] : vector<8x8xf32> to vector<8xf32>
    %154 = vector.shape_cast %153 : vector<8xf32> to vector<8x1xf32>
    %155 = tpu.reciprocal %154 {approx = true} : vector<8x1xf32> -> vector<8x1xf32>
    %156 = vector.broadcast %155 : vector<8x1xf32> to vector<8x8xf32>
    %157 = arith.mulf %152, %156 : vector<8x8xf32>
    %cst_73 = arith.constant dense<0.000000e+00> : vector<8x32xf32>
    %158 = tpu.matmul %157, %144, %cst_73 {dimension_numbers = #tpu.dot_dimension_numbers<[1], [0], [0], [1], [0, 0, 1, 1], [], []>} : vector<8x8xf32>, vector<8x32xf32>, vector<8x32xf32> -> vector<8x32xf32>
    %159 = arith.addf %135, %158 : vector<8x32xf32>
    %c24_i32_74 = arith.constant 24 : i32
    %160 = vector.broadcast %c24_i32_74 : i32 to vector<8x32xi32>
    %161 = arith.cmpi sge, %86, %160 : vector<8x32xi32>
    %c32_i32 = arith.constant 32 : i32
    %162 = vector.broadcast %c32_i32 : i32 to vector<8x32xi32>
    %163 = arith.cmpi slt, %86, %162 : vector<8x32xi32>
    %164 = arith.andi %161, %163 : vector<8x32xi1>
    %cst_75 = arith.constant 0.000000e+00 : f32
    %165 = vector.broadcast %cst_75 : f32 to vector<8x32xf32>
    %166 = arith.select %164, %79, %165 : vector<8x32xi1>, vector<8x32xf32>
    %cst_76 = arith.constant 0.000000e+00 : f32
    %167 = vector.broadcast %cst_76 : f32 to vector<8x32xf32>
    %168 = arith.select %164, %85, %167 : vector<8x32xi1>, vector<8x32xf32>
    %cst_77 = arith.constant dense<0.000000e+00> : vector<8x8xf32>
    %169 = tpu.matmul %166, %82, %cst_77 {dimension_numbers = #tpu.dot_dimension_numbers<[1], [1], [0], [0], [0, 0, 1, 0], [], []>} : vector<8x32xf32>, vector<8x32xf32>, vector<8x8xf32> -> vector<8x8xf32>
    %cst_78 = arith.constant 0.353553385 : f32
    %170 = vector.broadcast %cst_78 : f32 to vector<8x8xf32>
    %171 = arith.mulf %169, %170 : vector<8x8xf32>
    %cst_79 = arith.constant dense<0xFF800000> : vector<8xf32>
    %172 = vector.multi_reduction <maximumf>, %171, %cst_79 [1] : vector<8x8xf32> to vector<8xf32>
    %173 = vector.shape_cast %172 : vector<8xf32> to vector<8x1xf32>
    %174 = vector.broadcast %173 : vector<8x1xf32> to vector<8x8xf32>
    %175 = arith.subf %171, %174 : vector<8x8xf32>
    %176 = math.exp %175 : vector<8x8xf32>
    %cst_80 = arith.constant dense<0.000000e+00> : vector<8xf32>
    %177 = vector.multi_reduction <add>, %176, %cst_80 [1] : vector<8x8xf32> to vector<8xf32>
    %178 = vector.shape_cast %177 : vector<8xf32> to vector<8x1xf32>
    %179 = tpu.reciprocal %178 {approx = true} : vector<8x1xf32> -> vector<8x1xf32>
    %180 = vector.broadcast %179 : vector<8x1xf32> to vector<8x8xf32>
    %181 = arith.mulf %176, %180 : vector<8x8xf32>
    %cst_81 = arith.constant dense<0.000000e+00> : vector<8x32xf32>
    %182 = tpu.matmul %181, %168, %cst_81 {dimension_numbers = #tpu.dot_dimension_numbers<[1], [0], [0], [1], [0, 0, 1, 1], [], []>} : vector<8x8xf32>, vector<8x32xf32>, vector<8x32xf32> -> vector<8x32xf32>
    %183 = arith.addf %159, %182 : vector<8x32xf32>
    %cst_82 = arith.constant dense<0.000000e+00> : vector<8x32xf32>
    %184 = tpu.matmul %183, %53, %cst_82 {dimension_numbers = #tpu.dot_dimension_numbers<[1], [0], [0], [1], [0, 0, 1, 1], [], []>} : vector<8x32xf32>, vector<32x32xf32>, vector<8x32xf32> -> vector<8x32xf32>
    %185 = vector.broadcast %54 : vector<1x32xf32> to vector<8x32xf32>
    %186 = arith.addf %184, %185 : vector<8x32xf32>
    %187 = arith.addf %44, %186 : vector<8x32xf32>
    %c0_83 = arith.constant 0 : index
    %c0_84 = arith.constant 0 : index
    %188 = vector.load %arg18[%c0_83, %c0_84] : memref<1x32xf32, #tpu.memory_space<vmem>>, vector<1x32xf32>
    %c0_85 = arith.constant 0 : index
    %c0_86 = arith.constant 0 : index
    %189 = vector.load %arg19[%c0_85, %c0_86] : memref<1x32xf32, #tpu.memory_space<vmem>>, vector<1x32xf32>
    %c0_87 = arith.constant 0 : index
    %c0_88 = arith.constant 0 : index
    %190 = vector.load %arg20[%c0_87, %c0_88] : memref<32x32xf32, #tpu.memory_space<vmem>>, vector<32x32xf32>
    %c0_89 = arith.constant 0 : index
    %c0_90 = arith.constant 0 : index
    %191 = vector.load %arg21[%c0_89, %c0_90] : memref<32x32xf32, #tpu.memory_space<vmem>>, vector<32x32xf32>
    %c0_91 = arith.constant 0 : index
    %c0_92 = arith.constant 0 : index
    %192 = vector.load %arg22[%c0_91, %c0_92] : memref<1x32xf32, #tpu.memory_space<vmem>>, vector<1x32xf32>
    %c0_93 = arith.constant 0 : index
    %c0_94 = arith.constant 0 : index
    %193 = vector.load %arg23[%c0_93, %c0_94] : memref<1x32xf32, #tpu.memory_space<vmem>>, vector<1x32xf32>
    %c0_95 = arith.constant 0 : index
    %c0_96 = arith.constant 0 : index
    %194 = vector.load %arg24[%c0_95, %c0_96] : memref<3x32xf32, #tpu.memory_space<vmem>>, vector<3x32xf32>
    %c0_97 = arith.constant 0 : index
    %c0_98 = arith.constant 0 : index
    %195 = vector.load %arg25[%c0_97, %c0_98] : memref<1x32xf32, #tpu.memory_space<vmem>>, vector<1x32xf32>
    %c0_99 = arith.constant 0 : index
    %c0_100 = arith.constant 0 : index
    %196 = vector.load %arg26[%c0_99, %c0_100] : memref<1x32xf32, #tpu.memory_space<vmem>>, vector<1x32xf32>
    %c0_101 = arith.constant 0 : index
    %c0_102 = arith.constant 0 : index
    %197 = vector.load %arg27[%c0_101, %c0_102] : memref<1x32xf32, #tpu.memory_space<vmem>>, vector<1x32xf32>
    %c0_103 = arith.constant 0 : index
    %c0_104 = arith.constant 0 : index
    %198 = vector.load %arg28[%c0_103, %c0_104] : memref<1x32xf32, #tpu.memory_space<vmem>>, vector<1x32xf32>
    %c0_105 = arith.constant 0 : index
    %c0_106 = arith.constant 0 : index
    %199 = vector.load %arg29[%c0_105, %c0_106] : memref<1x32xf32, #tpu.memory_space<vmem>>, vector<1x32xf32>
    %c0_107 = arith.constant 0 : index
    %c0_108 = arith.constant 0 : index
    %200 = vector.load %arg30[%c0_107, %c0_108] : memref<32x32xf32, #tpu.memory_space<vmem>>, vector<32x32xf32>
    %c0_109 = arith.constant 0 : index
    %c0_110 = arith.constant 0 : index
    %201 = vector.load %arg31[%c0_109, %c0_110] : memref<1x32xf32, #tpu.memory_space<vmem>>, vector<1x32xf32>
    %cst_111 = arith.constant dense<0.000000e+00> : vector<8xf32>
    %202 = vector.multi_reduction <add>, %187, %cst_111 [1] : vector<8x32xf32> to vector<8xf32>
    %203 = vector.shape_cast %202 : vector<8xf32> to vector<8x1xf32>
    %cst_112 = arith.constant 3.200000e+01 : f32
    %204 = vector.broadcast %cst_112 : f32 to vector<8x1xf32>
    %205 = arith.divf %203, %204 : vector<8x1xf32>
    %206 = vector.broadcast %205 : vector<8x1xf32> to vector<8x32xf32>
    %207 = arith.subf %187, %206 : vector<8x32xf32>
    %208 = arith.mulf %207, %207 : vector<8x32xf32>
    %cst_113 = arith.constant dense<0.000000e+00> : vector<8xf32>
    %209 = vector.multi_reduction <add>, %208, %cst_113 [1] : vector<8x32xf32> to vector<8xf32>
    %210 = vector.shape_cast %209 : vector<8xf32> to vector<8x1xf32>
    %cst_114 = arith.constant 3.200000e+01 : f32
    %211 = vector.broadcast %cst_114 : f32 to vector<8x1xf32>
    %212 = arith.divf %210, %211 : vector<8x1xf32>
    %213 = vector.broadcast %205 : vector<8x1xf32> to vector<8x32xf32>
    %214 = arith.subf %187, %213 : vector<8x32xf32>
    %cst_115 = arith.constant 9.99999974E-6 : f32
    %215 = vector.broadcast %cst_115 : f32 to vector<8x1xf32>
    %216 = arith.addf %212, %215 : vector<8x1xf32>
    %217 = math.rsqrt %216 : vector<8x1xf32>
    %218 = vector.broadcast %217 : vector<8x1xf32> to vector<8x32xf32>
    %219 = arith.mulf %214, %218 : vector<8x32xf32>
    %220 = vector.broadcast %188 : vector<1x32xf32> to vector<8x32xf32>
    %221 = arith.mulf %219, %220 : vector<8x32xf32>
    %222 = vector.broadcast %189 : vector<1x32xf32> to vector<8x32xf32>
    %223 = arith.addf %221, %222 : vector<8x32xf32>
    %cst_116 = arith.constant dense<0.000000e+00> : vector<8x32xf32>
    %224 = tpu.matmul %223, %190, %cst_116 {dimension_numbers = #tpu.dot_dimension_numbers<[1], [0], [0], [1], [0, 0, 1, 1], [], []>} : vector<8x32xf32>, vector<32x32xf32>, vector<8x32xf32> -> vector<8x32xf32>
    %225 = vector.broadcast %192 : vector<1x32xf32> to vector<8x32xf32>
    %226 = arith.addf %224, %225 : vector<8x32xf32>
    %cst_117 = arith.constant dense<0.000000e+00> : vector<8x32xf32>
    %227 = tpu.matmul %223, %191, %cst_117 {dimension_numbers = #tpu.dot_dimension_numbers<[1], [0], [0], [1], [0, 0, 1, 1], [], []>} : vector<8x32xf32>, vector<32x32xf32>, vector<8x32xf32> -> vector<8x32xf32>
    %228 = vector.broadcast %193 : vector<1x32xf32> to vector<8x32xf32>
    %229 = arith.addf %227, %228 : vector<8x32xf32>
    %230 = arith.negf %229 : vector<8x32xf32>
    %231 = math.exp %230 : vector<8x32xf32>
    %cst_118 = arith.constant 1.000000e+00 : f32
    %232 = vector.broadcast %cst_118 : f32 to vector<8x32xf32>
    %233 = arith.addf %232, %231 : vector<8x32xf32>
    %234 = arith.divf %232, %233 : vector<8x32xf32>
    %235 = arith.mulf %226, %234 : vector<8x32xf32>
    %236 = tpu.iota {dimensions = array<i32: 0>} : vector<8x32xi32>
    %c1_i32 = arith.constant 1 : i32
    %237 = vector.broadcast %c1_i32 : i32 to vector<8x32xi32>
    %238 = arith.cmpi sge, %236, %237 : vector<8x32xi32>
    %239 = vector.extract_strided_slice %235 {offsets = [7, 0], sizes = [1, 32], strides = [1, 1]} : vector<8x32xf32> to vector<1x32xf32>
    %240 = vector.extract_strided_slice %235 {offsets = [0, 0], sizes = [7, 32], strides = [1, 1]} : vector<8x32xf32> to vector<7x32xf32>
    %241 = tpu.concatenate %239, %240 in 0 : vector<1x32xf32>, vector<7x32xf32> -> vector<8x32xf32>
    %cst_119 = arith.constant 0.000000e+00 : f32
    %242 = vector.broadcast %cst_119 : f32 to vector<8x32xf32>
    %243 = arith.select %238, %241, %242 : vector<8x32xi1>, vector<8x32xf32>
    %c6_i32 = arith.constant 6 : i32
    %244 = vector.broadcast %c6_i32 : i32 to vector<8x32xi32>
    %245 = arith.cmpi sle, %236, %244 : vector<8x32xi32>
    %246 = vector.extract_strided_slice %235 {offsets = [1, 0], sizes = [7, 32], strides = [1, 1]} : vector<8x32xf32> to vector<7x32xf32>
    %247 = vector.extract_strided_slice %235 {offsets = [0, 0], sizes = [1, 32], strides = [1, 1]} : vector<8x32xf32> to vector<1x32xf32>
    %248 = tpu.concatenate %246, %247 in 0 : vector<7x32xf32>, vector<1x32xf32> -> vector<8x32xf32>
    %cst_120 = arith.constant 0.000000e+00 : f32
    %249 = vector.broadcast %cst_120 : f32 to vector<8x32xf32>
    %250 = arith.select %245, %248, %249 : vector<8x32xi1>, vector<8x32xf32>
    %251 = vector.extract_strided_slice %194 {offsets = [0, 0], sizes = [1, 32], strides = [1, 1]} : vector<3x32xf32> to vector<1x32xf32>
    %252 = vector.broadcast %251 : vector<1x32xf32> to vector<8x32xf32>
    %253 = arith.mulf %243, %252 : vector<8x32xf32>
    %254 = vector.extract_strided_slice %194 {offsets = [1, 0], sizes = [1, 32], strides = [1, 1]} : vector<3x32xf32> to vector<1x32xf32>
    %255 = vector.broadcast %254 : vector<1x32xf32> to vector<8x32xf32>
    %256 = arith.mulf %235, %255 : vector<8x32xf32>
    %257 = arith.addf %253, %256 : vector<8x32xf32>
    %258 = vector.extract_strided_slice %194 {offsets = [2, 0], sizes = [1, 32], strides = [1, 1]} : vector<3x32xf32> to vector<1x32xf32>
    %259 = vector.broadcast %258 : vector<1x32xf32> to vector<8x32xf32>
    %260 = arith.mulf %250, %259 : vector<8x32xf32>
    %261 = arith.addf %257, %260 : vector<8x32xf32>
    %262 = vector.broadcast %195 : vector<1x32xf32> to vector<8x32xf32>
    %263 = arith.addf %261, %262 : vector<8x32xf32>
    %264 = vector.broadcast %198 : vector<1x32xf32> to vector<8x32xf32>
    %265 = arith.subf %263, %264 : vector<8x32xf32>
    %cst_121 = arith.constant 9.99999974E-6 : f32
    %266 = vector.broadcast %cst_121 : f32 to vector<1x32xf32>
    %267 = arith.addf %199, %266 : vector<1x32xf32>
    %268 = math.rsqrt %267 : vector<1x32xf32>
    %269 = vector.broadcast %268 : vector<1x32xf32> to vector<8x32xf32>
    %270 = arith.mulf %265, %269 : vector<8x32xf32>
    %271 = vector.broadcast %196 : vector<1x32xf32> to vector<8x32xf32>
    %272 = arith.mulf %270, %271 : vector<8x32xf32>
    %273 = vector.broadcast %197 : vector<1x32xf32> to vector<8x32xf32>
    %274 = arith.addf %272, %273 : vector<8x32xf32>
    %275 = arith.negf %274 : vector<8x32xf32>
    %276 = math.exp %275 : vector<8x32xf32>
    %cst_122 = arith.constant 1.000000e+00 : f32
    %277 = vector.broadcast %cst_122 : f32 to vector<8x32xf32>
    %278 = arith.addf %277, %276 : vector<8x32xf32>
    %279 = arith.divf %277, %278 : vector<8x32xf32>
    %280 = arith.mulf %274, %279 : vector<8x32xf32>
    %cst_123 = arith.constant dense<0.000000e+00> : vector<8x32xf32>
    %281 = tpu.matmul %280, %200, %cst_123 {dimension_numbers = #tpu.dot_dimension_numbers<[1], [0], [0], [1], [0, 0, 1, 1], [], []>} : vector<8x32xf32>, vector<32x32xf32>, vector<8x32xf32> -> vector<8x32xf32>
    %282 = vector.broadcast %201 : vector<1x32xf32> to vector<8x32xf32>
    %283 = arith.addf %281, %282 : vector<8x32xf32>
    %284 = arith.addf %187, %283 : vector<8x32xf32>
    %c0_124 = arith.constant 0 : index
    %c0_125 = arith.constant 0 : index
    %285 = vector.load %arg32[%c0_124, %c0_125] : memref<1x32xf32, #tpu.memory_space<vmem>>, vector<1x32xf32>
    %c0_126 = arith.constant 0 : index
    %c0_127 = arith.constant 0 : index
    %286 = vector.load %arg33[%c0_126, %c0_127] : memref<1x32xf32, #tpu.memory_space<vmem>>, vector<1x32xf32>
    %c0_128 = arith.constant 0 : index
    %c0_129 = arith.constant 0 : index
    %287 = vector.load %arg34[%c0_128, %c0_129] : memref<32x64xf32, #tpu.memory_space<vmem>>, vector<32x64xf32>
    %c0_130 = arith.constant 0 : index
    %c0_131 = arith.constant 0 : index
    %288 = vector.load %arg35[%c0_130, %c0_131] : memref<1x64xf32, #tpu.memory_space<vmem>>, vector<1x64xf32>
    %c0_132 = arith.constant 0 : index
    %c0_133 = arith.constant 0 : index
    %289 = vector.load %arg36[%c0_132, %c0_133] : memref<64x32xf32, #tpu.memory_space<vmem>>, vector<64x32xf32>
    %c0_134 = arith.constant 0 : index
    %c0_135 = arith.constant 0 : index
    %290 = vector.load %arg37[%c0_134, %c0_135] : memref<1x32xf32, #tpu.memory_space<vmem>>, vector<1x32xf32>
    %cst_136 = arith.constant dense<0.000000e+00> : vector<8xf32>
    %291 = vector.multi_reduction <add>, %284, %cst_136 [1] : vector<8x32xf32> to vector<8xf32>
    %292 = vector.shape_cast %291 : vector<8xf32> to vector<8x1xf32>
    %cst_137 = arith.constant 3.200000e+01 : f32
    %293 = vector.broadcast %cst_137 : f32 to vector<8x1xf32>
    %294 = arith.divf %292, %293 : vector<8x1xf32>
    %295 = vector.broadcast %294 : vector<8x1xf32> to vector<8x32xf32>
    %296 = arith.subf %284, %295 : vector<8x32xf32>
    %297 = arith.mulf %296, %296 : vector<8x32xf32>
    %cst_138 = arith.constant dense<0.000000e+00> : vector<8xf32>
    %298 = vector.multi_reduction <add>, %297, %cst_138 [1] : vector<8x32xf32> to vector<8xf32>
    %299 = vector.shape_cast %298 : vector<8xf32> to vector<8x1xf32>
    %cst_139 = arith.constant 3.200000e+01 : f32
    %300 = vector.broadcast %cst_139 : f32 to vector<8x1xf32>
    %301 = arith.divf %299, %300 : vector<8x1xf32>
    %302 = vector.broadcast %294 : vector<8x1xf32> to vector<8x32xf32>
    %303 = arith.subf %284, %302 : vector<8x32xf32>
    %cst_140 = arith.constant 9.99999974E-6 : f32
    %304 = vector.broadcast %cst_140 : f32 to vector<8x1xf32>
    %305 = arith.addf %301, %304 : vector<8x1xf32>
    %306 = math.rsqrt %305 : vector<8x1xf32>
    %307 = vector.broadcast %306 : vector<8x1xf32> to vector<8x32xf32>
    %308 = arith.mulf %303, %307 : vector<8x32xf32>
    %309 = vector.broadcast %285 : vector<1x32xf32> to vector<8x32xf32>
    %310 = arith.mulf %308, %309 : vector<8x32xf32>
    %311 = vector.broadcast %286 : vector<1x32xf32> to vector<8x32xf32>
    %312 = arith.addf %310, %311 : vector<8x32xf32>
    %cst_141 = arith.constant dense<0.000000e+00> : vector<8x64xf32>
    %313 = tpu.matmul %312, %287, %cst_141 {dimension_numbers = #tpu.dot_dimension_numbers<[1], [0], [0], [1], [0, 0, 1, 1], [], []>} : vector<8x32xf32>, vector<32x64xf32>, vector<8x64xf32> -> vector<8x64xf32>
    %314 = vector.broadcast %288 : vector<1x64xf32> to vector<8x64xf32>
    %315 = arith.addf %313, %314 : vector<8x64xf32>
    %316 = arith.negf %315 : vector<8x64xf32>
    %317 = math.exp %316 : vector<8x64xf32>
    %cst_142 = arith.constant 1.000000e+00 : f32
    %318 = vector.broadcast %cst_142 : f32 to vector<8x64xf32>
    %319 = arith.addf %318, %317 : vector<8x64xf32>
    %320 = arith.divf %318, %319 : vector<8x64xf32>
    %321 = arith.mulf %315, %320 : vector<8x64xf32>
    %cst_143 = arith.constant dense<0.000000e+00> : vector<8x32xf32>
    %322 = tpu.matmul %321, %289, %cst_143 {dimension_numbers = #tpu.dot_dimension_numbers<[1], [0], [0], [1], [0, 0, 1, 1], [], []>} : vector<8x64xf32>, vector<64x32xf32>, vector<8x32xf32> -> vector<8x32xf32>
    %323 = vector.broadcast %290 : vector<1x32xf32> to vector<8x32xf32>
    %324 = arith.addf %322, %323 : vector<8x32xf32>
    %cst_144 = arith.constant 5.000000e-01 : f32
    %325 = vector.broadcast %cst_144 : f32 to vector<8x32xf32>
    %326 = arith.mulf %325, %324 : vector<8x32xf32>
    %327 = arith.addf %284, %326 : vector<8x32xf32>
    %c0_145 = arith.constant 0 : index
    %c0_146 = arith.constant 0 : index
    %c0_147 = arith.constant 0 : index
    %328 = vector.load %arg38[%c0_145, %c0_146, %c0_147] : memref<1x8x32xf32, #tpu.memory_space<vmem>>, vector<1x8x32xf32>
    %329 = vector.shape_cast %328 : vector<1x8x32xf32> to vector<8x32xf32>
    %330 = vector.shape_cast %327 : vector<8x32xf32> to vector<1x8x32xf32>
    tpu.vector_store %arg38[%c0_145, %c0_146, %c0_147], %330 {strides = array<i32>} : memref<1x8x32xf32, #tpu.memory_space<vmem>>, vector<1x8x32xf32>,
    return
  }
  func.func @transform_0(%arg0: i32) -> (i32, i32, i32) {
    %c0_i32 = arith.constant 0 : i32
    %c0_i32_0 = arith.constant 0 : i32
    %c0_i32_1 = arith.constant 0 : i32
    return %arg0, %c0_i32, %c0_i32_0 : i32, i32, i32
  }
  func.func @transform_1(%arg0: i32) -> (i32, i32) {
    %c0_i32 = arith.constant 0 : i32
    %c0_i32_0 = arith.constant 0 : i32
    %c0_i32_1 = arith.constant 0 : i32
    return %c0_i32, %c0_i32_0 : i32, i32
  }
  func.func @transform_2(%arg0: i32) -> (i32, i32) {
    %c0_i32 = arith.constant 0 : i32
    %c0_i32_0 = arith.constant 0 : i32
    %c0_i32_1 = arith.constant 0 : i32
    return %c0_i32, %c0_i32_0 : i32, i32
  }
  func.func @transform_3(%arg0: i32) -> (i32, i32) {
    %c0_i32 = arith.constant 0 : i32
    %c0_i32_0 = arith.constant 0 : i32
    %c0_i32_1 = arith.constant 0 : i32
    return %c0_i32, %c0_i32_0 : i32, i32
  }
  func.func @transform_4(%arg0: i32) -> (i32, i32) {
    %c0_i32 = arith.constant 0 : i32
    %c0_i32_0 = arith.constant 0 : i32
    %c0_i32_1 = arith.constant 0 : i32
    return %c0_i32, %c0_i32_0 : i32, i32
  }
  func.func @transform_5(%arg0: i32) -> (i32, i32) {
    %c0_i32 = arith.constant 0 : i32
    %c0_i32_0 = arith.constant 0 : i32
    %c0_i32_1 = arith.constant 0 : i32
    return %c0_i32, %c0_i32_0 : i32, i32
  }
  func.func @transform_6(%arg0: i32) -> (i32, i32) {
    %c0_i32 = arith.constant 0 : i32
    %c0_i32_0 = arith.constant 0 : i32
    %c0_i32_1 = arith.constant 0 : i32
    return %c0_i32, %c0_i32_0 : i32, i32
  }
  func.func @transform_7(%arg0: i32) -> (i32, i32) {
    %c0_i32 = arith.constant 0 : i32
    %c0_i32_0 = arith.constant 0 : i32
    %c0_i32_1 = arith.constant 0 : i32
    return %c0_i32, %c0_i32_0 : i32, i32
  }
  func.func @transform_8(%arg0: i32) -> (i32, i32) {
    %c0_i32 = arith.constant 0 : i32
    %c0_i32_0 = arith.constant 0 : i32
    %c0_i32_1 = arith.constant 0 : i32
    return %c0_i32, %c0_i32_0 : i32, i32
  }
  func.func @transform_9(%arg0: i32) -> (i32, i32) {
    %c0_i32 = arith.constant 0 : i32
    %c0_i32_0 = arith.constant 0 : i32
    %c0_i32_1 = arith.constant 0 : i32
    return %c0_i32, %c0_i32_0 : i32, i32
  }
  func.func @transform_10(%arg0: i32) -> (i32, i32) {
    %c0_i32 = arith.constant 0 : i32
    %c0_i32_0 = arith.constant 0 : i32
    %c0_i32_1 = arith.constant 0 : i32
    return %c0_i32, %c0_i32_0 : i32, i32
  }
  func.func @transform_11(%arg0: i32) -> (i32, i32) {
    %c0_i32 = arith.constant 0 : i32
    %c0_i32_0 = arith.constant 0 : i32
    %c0_i32_1 = arith.constant 0 : i32
    return %c0_i32, %c0_i32_0 : i32, i32
  }
  func.func @transform_12(%arg0: i32) -> (i32, i32) {
    %c0_i32 = arith.constant 0 : i32
    %c0_i32_0 = arith.constant 0 : i32
    %c0_i32_1 = arith.constant 0 : i32
    return %c0_i32, %c0_i32_0 : i32, i32
  }
  func.func @transform_13(%arg0: i32) -> (i32, i32) {
    %c0_i32 = arith.constant 0 : i32
    %c0_i32_0 = arith.constant 0 : i32
    %c0_i32_1 = arith.constant 0 : i32
    return %c0_i32, %c0_i32_0 : i32, i32
  }
  func.func @transform_14(%arg0: i32) -> (i32, i32) {
    %c0_i32 = arith.constant 0 : i32
    %c0_i32_0 = arith.constant 0 : i32
    %c0_i32_1 = arith.constant 0 : i32
    return %c0_i32, %c0_i32_0 : i32, i32
  }
  func.func @transform_15(%arg0: i32) -> (i32, i32) {
    %c0_i32 = arith.constant 0 : i32
    %c0_i32_0 = arith.constant 0 : i32
    %c0_i32_1 = arith.constant 0 : i32
    return %c0_i32, %c0_i32_0 : i32, i32
  }
  func.func @transform_16(%arg0: i32) -> (i32, i32) {
    %c0_i32 = arith.constant 0 : i32
    %c0_i32_0 = arith.constant 0 : i32
    %c0_i32_1 = arith.constant 0 : i32
    return %c0_i32, %c0_i32_0 : i32, i32
  }
  func.func @transform_17(%arg0: i32) -> (i32, i32) {
    %c0_i32 = arith.constant 0 : i32
    %c0_i32_0 = arith.constant 0 : i32
    %c0_i32_1 = arith.constant 0 : i32
    return %c0_i32, %c0_i32_0 : i32, i32
  }
  func.func @transform_18(%arg0: i32) -> (i32, i32) {
    %c0_i32 = arith.constant 0 : i32
    %c0_i32_0 = arith.constant 0 : i32
    %c0_i32_1 = arith.constant 0 : i32
    return %c0_i32, %c0_i32_0 : i32, i32
  }
  func.func @transform_19(%arg0: i32) -> (i32, i32) {
    %c0_i32 = arith.constant 0 : i32
    %c0_i32_0 = arith.constant 0 : i32
    %c0_i32_1 = arith.constant 0 : i32
    return %c0_i32, %c0_i32_0 : i32, i32
  }
  func.func @transform_20(%arg0: i32) -> (i32, i32) {
    %c0_i32 = arith.constant 0 : i32
    %c0_i32_0 = arith.constant 0 : i32
    %c0_i32_1 = arith.constant 0 : i32
    return %c0_i32, %c0_i32_0 : i32, i32
  }
  func.func @transform_21(%arg0: i32) -> (i32, i32) {
    %c0_i32 = arith.constant 0 : i32
    %c0_i32_0 = arith.constant 0 : i32
    %c0_i32_1 = arith.constant 0 : i32
    return %c0_i32, %c0_i32_0 : i32, i32
  }
  func.func @transform_22(%arg0: i32) -> (i32, i32) {
    %c0_i32 = arith.constant 0 : i32
    %c0_i32_0 = arith.constant 0 : i32
    %c0_i32_1 = arith.constant 0 : i32
    return %c0_i32, %c0_i32_0 : i32, i32
  }
  func.func @transform_23(%arg0: i32) -> (i32, i32) {
    %c0_i32 = arith.constant 0 : i32
    %c0_i32_0 = arith.constant 0 : i32
    %c0_i32_1 = arith.constant 0 : i32
    return %c0_i32, %c0_i32_0 : i32, i32
  }
  func.func @transform_24(%arg0: i32) -> (i32, i32) {
    %c0_i32 = arith.constant 0 : i32
    %c0_i32_0 = arith.constant 0 : i32
    %c0_i32_1 = arith.constant 0 : i32
    return %c0_i32, %c0_i32_0 : i32, i32
  }
  func.func @transform_25(%arg0: i32) -> (i32, i32) {
    %c0_i32 = arith.constant 0 : i32
    %c0_i32_0 = arith.constant 0 : i32
    %c0_i32_1 = arith.constant 0 : i32
    return %c0_i32, %c0_i32_0 : i32, i32
  }
  func.func @transform_26(%arg0: i32) -> (i32, i32) {
    %c0_i32 = arith.constant 0 : i32
    %c0_i32_0 = arith.constant 0 : i32
    %c0_i32_1 = arith.constant 0 : i32
    return %c0_i32, %c0_i32_0 : i32, i32
  }
  func.func @transform_27(%arg0: i32) -> (i32, i32) {
    %c0_i32 = arith.constant 0 : i32
    %c0_i32_0 = arith.constant 0 : i32
    %c0_i32_1 = arith.constant 0 : i32
    return %c0_i32, %c0_i32_0 : i32, i32
  }
  func.func @transform_28(%arg0: i32) -> (i32, i32) {
    %c0_i32 = arith.constant 0 : i32
    %c0_i32_0 = arith.constant 0 : i32
    %c0_i32_1 = arith.constant 0 : i32
    return %c0_i32, %c0_i32_0 : i32, i32
  }
  func.func @transform_29(%arg0: i32) -> (i32, i32) {
    %c0_i32 = arith.constant 0 : i32
    %c0_i32_0 = arith.constant 0 : i32
    %c0_i32_1 = arith.constant 0 : i32
    return %c0_i32, %c0_i32_0 : i32, i32
  }
  func.func @transform_30(%arg0: i32) -> (i32, i32) {
    %c0_i32 = arith.constant 0 : i32
    %c0_i32_0 = arith.constant 0 : i32
    %c0_i32_1 = arith.constant 0 : i32
    return %c0_i32, %c0_i32_0 : i32, i32
  }
  func.func @transform_31(%arg0: i32) -> (i32, i32) {
    %c0_i32 = arith.constant 0 : i32
    %c0_i32_0 = arith.constant 0 : i32
    %c0_i32_1 = arith.constant 0 : i32
    return %c0_i32, %c0_i32_0 : i32, i32
  }
  func.func @transform_32(%arg0: i32) -> (i32, i32) {
    %c0_i32 = arith.constant 0 : i32
    %c0_i32_0 = arith.constant 0 : i32
    %c0_i32_1 = arith.constant 0 : i32
    return %c0_i32, %c0_i32_0 : i32, i32
  }
  func.func @transform_33(%arg0: i32) -> (i32, i32) {
    %c0_i32 = arith.constant 0 : i32
    %c0_i32_0 = arith.constant 0 : i32
    %c0_i32_1 = arith.constant 0 : i32
    return %c0_i32, %c0_i32_0 : i32, i32
  }
  func.func @transform_34(%arg0: i32) -> (i32, i32) {
    %c0_i32 = arith.constant 0 : i32
    %c0_i32_0 = arith.constant 0 : i32
    %c0_i32_1 = arith.constant 0 : i32
    return %c0_i32, %c0_i32_0 : i32, i32
  }
  func.func @transform_35(%arg0: i32) -> (i32, i32) {
    %c0_i32 = arith.constant 0 : i32
    %c0_i32_0 = arith.constant 0 : i32
    %c0_i32_1 = arith.constant 0 : i32
    return %c0_i32, %c0_i32_0 : i32, i32
  }
  func.func @transform_36(%arg0: i32) -> (i32, i32) {
    %c0_i32 = arith.constant 0 : i32
    %c0_i32_0 = arith.constant 0 : i32
    %c0_i32_1 = arith.constant 0 : i32
    return %c0_i32, %c0_i32_0 : i32, i32
  }
  func.func @transform_37(%arg0: i32) -> (i32, i32, i32) {
    %c0_i32 = arith.constant 0 : i32
    %c0_i32_0 = arith.constant 0 : i32
    %c0_i32_1 = arith.constant 0 : i32
    return %arg0, %c0_i32, %c0_i32_0 : i32, i32, i32
  }
}

</mosaic_0001>

<bundles_post_ra>
// kernel: conformer_pallas.1
= control target key start
LH: loop header
LB: loop body
LE: loop exit
PB: predicated region body
PF: predicated region fallthrough
CT: control target
= control target key end

     0   :  { %s3634_s6 = smov 1   ;;  %s3635_s10 = smov 2   ;;  %s4208_s0 = inlined_call_operand.smem [shape: u32[38], index: -1, kind: input, shape index: {}] }
   0x1   :  { %s3683_s5 = sld [smem:[%s4208_s0]]   ;;  %s3636_s14 = smov 3  }
   0x2   :  { %s3688_s9 = sld [smem:[%s4208_s0 + %s3634_s6]]   ;;  %s3637_s18 = smov 4  }
   0x3   :  { %s3693_s13 = sld [smem:[%s4208_s0 + %s3635_s10]]   ;;  %s3638_s22 = smov 5  }
   0x4   :  { %s3698_s17 = sld [smem:[%s4208_s0 + %s3636_s14]]   ;;  %s3639_s26 = smov 6  }
   0x5   :  { %s3703_s21 = sld [smem:[%s4208_s0 + %s3637_s18]]   ;;  %s3640_s30 = smov 7  }
   0x6   :  { %s3708_s25 = sld [smem:[%s4208_s0 + %s3638_s22]]   ;;  %s3641_s4 = smov 8  }
   0x7   :  { %4218 = sst [smem:[#allocation5_spill]] %s3683_s5  ;;  %s3642_s10 = smov 9  }
   0x8   :  { %4219 = sst [smem:[#allocation6_spill]] %s3688_s9  ;;  %s3643_s15 = smov 10  }
   0x9   :  { %4220 = sst [smem:[#allocation7_spill]] %s3693_s13  ;;  %s3644_s20 = smov 11  }
   0xa   :  { %s3713_s29 = sld [smem:[%s4208_s0 + %s3639_s26]]   ;;  %s3645_s26 = smov 12  }
   0xb   :  { %s3718_s3 = sld [smem:[%s4208_s0 + %s3640_s30]]   ;;  %s3646_s1 = smov 13  }
   0xc   :  { %s3723_s8 = sld [smem:[%s4208_s0 + %s3641_s4]]   ;;  %s3647_s7 = smov 14  }
   0xd   :  { %s3728_s14 = sld [smem:[%s4208_s0 + %s3642_s10]]   ;;  %s3649_s22 = smov 16  }
   0xe   :  { %s3733_s19 = sld [smem:[%s4208_s0 + %s3643_s15]]   ;;  %s3648_s15 = smov 15  }
   0xf   :  { %s3738_s24 = sld [smem:[%s4208_s0 + %s3644_s20]]   ;;  %s3650_s28 = smov 17  }
  0x10   :  { %s3743_s30 = sld [smem:[%s4208_s0 + %s3645_s26]]  }
  0x11   :  { %4221 = sst [smem:[#allocation8_spill]] %s3718_s3 }
  0x12   :  { %4222 = sst [smem:[#allocation9_spill]] %s3723_s8 }
  0x13   :  { %4223 = sst [smem:[#allocation10_spill]] %s3728_s14 }
  0x14   :  { %s3748_s6 = sld [smem:[%s4208_s0 + %s3646_s1]]  }
  0x15   :  { %s3753_s12 = sld [smem:[%s4208_s0 + %s3647_s7]]   ;;  %s3651_s7 = smov 18  }
  0x16   :  { %s3758_s20 = sld [smem:[%s4208_s0 + %s3648_s15]]   ;;  %s3652_s15 = smov 19  }
  0x17   :  { %s3763_s27 = sld [smem:[%s4208_s0 + %s3649_s22]]   ;;  %s3653_s22 = smov 20  }
  0x18   :  { %s3768_s4 = sld [smem:[%s4208_s0 + %s3650_s28]]   ;;  %s3654_s28 = smov 21  }
  0x1a   :  { %4224 = sst [smem:[#allocation11_spill]] %s3748_s6 }
  0x1b   :  { %4225 = sst [smem:[#allocation12_spill]] %s3753_s12 }
  0x1c   :  { %4226 = sst [smem:[#allocation13_spill]] %s3758_s20 }
  0x1d   :  { %4227 = sst [smem:[#allocation14_spill]] %s3763_s27 }
  0x1e   :  { %4228 = sst [smem:[#allocation15_spill]] %s3768_s4 }
  0x1f   :  { %s3773_s12 = sld [smem:[%s4208_s0 + %s3651_s7]]   ;;  %s3655_s7 = smov 22  }
  0x20   :  { %s3778_s20 = sld [smem:[%s4208_s0 + %s3652_s15]]   ;;  %s3656_s15 = smov 23  }
  0x21   :  { %s3783_s27 = sld [smem:[%s4208_s0 + %s3653_s22]]   ;;  %s3657_s22 = smov 24  }
  0x22   :  { %s3788_s4 = sld [smem:[%s4208_s0 + %s3654_s28]]   ;;  %s3658_s28 = smov 25  }
  0x25   :  { %4229 = sst [smem:[#allocation16_spill]] %s3773_s12 }
  0x26   :  { %4230 = sst [smem:[#allocation17_spill]] %s3778_s20 }
  0x27   :  { %4231 = sst [smem:[#allocation18_spill]] %s3783_s27 }
  0x28   :  { %4232 = sst [smem:[#allocation19_spill]] %s3788_s4 }
  0x29   :  { %s3793_s12 = sld [smem:[%s4208_s0 + %s3655_s7]]   ;;  %s3659_s7 = smov 26  }
  0x2a   :  { %s3798_s20 = sld [smem:[%s4208_s0 + %s3656_s15]]   ;;  %s3660_s15 = smov 27  }
  0x2b   :  { %s3803_s27 = sld [smem:[%s4208_s0 + %s3657_s22]]   ;;  %s3661_s22 = smov 28  }
  0x2c   :  { %s3808_s4 = sld [smem:[%s4208_s0 + %s3658_s28]]   ;;  %s3662_s28 = smov 29  }
  0x2f   :  { %4233 = sst [smem:[#allocation20_spill]] %s3793_s12 }
  0x30   :  { %4234 = sst [smem:[#allocation21_spill]] %s3798_s20 }
  0x31   :  { %4235 = sst [smem:[#allocation22_spill]] %s3803_s27 }
  0x32   :  { %4236 = sst [smem:[#allocation23_spill]] %s3808_s4 }
  0x33   :  { %s3813_s12 = sld [smem:[%s4208_s0 + %s3659_s7]]   ;;  %s3663_s7 = smov 30  }
  0x34   :  { %s3818_s20 = sld [smem:[%s4208_s0 + %s3660_s15]]   ;;  %s3664_s15 = smov 31  }
  0x35   :  { %s3823_s27 = sld [smem:[%s4208_s0 + %s3661_s22]]   ;;  %s3665_s22 = smov 32  }
  0x36   :  { %s3828_s4 = sld [smem:[%s4208_s0 + %s3662_s28]]   ;;  %s3666_s28 = smov 33  }
  0x39   :  { %4237 = sst [smem:[#allocation24_spill]] %s3813_s12 }
  0x3a   :  { %4238 = sst [smem:[#allocation25_spill]] %s3818_s20 }
  0x3b   :  { %4239 = sst [smem:[#allocation26_spill]] %s3823_s27 }
  0x3c   :  { %4240 = sst [smem:[#allocation27_spill]] %s3828_s4 }
  0x3d   :  { %s3833_s12 = sld [smem:[%s4208_s0 + %s3663_s7]]   ;;  %s3667_s7 = smov 34  }
  0x3e   :  { %s3838_s20 = sld [smem:[%s4208_s0 + %s3664_s15]]   ;;  %s3668_s15 = smov 35  }
  0x3f   :  { %s3843_s27 = sld [smem:[%s4208_s0 + %s3665_s22]]   ;;  %s3669_s22 = smov 36  }
  0x40   :  { %s3848_s4 = sld [smem:[%s4208_s0 + %s3666_s28]]   ;;  %s3670_s28 = smov 37  }
  0x43   :  { %4241 = sst [smem:[#allocation28_spill]] %s3833_s12 }
  0x44   :  { %4242 = sst [smem:[#allocation29_spill]] %s3838_s20 }
  0x45   :  { %4243 = sst [smem:[#allocation30_spill]] %s3843_s27 }
  0x46   :  { %4244 = sst [smem:[#allocation31_spill]] %s3848_s4 }
  0x47   :  { %s3853_s12 = sld [smem:[%s4208_s0 + %s3667_s7]]  }
  0x48   :  { %s3858_s20 = sld [smem:[%s4208_s0 + %s3668_s15]]  }
  0x49   :  { %s3863_s27 = sld [smem:[%s4208_s0 + %s3669_s22]]  }
  0x4a   :  { %s3868_s4 = sld [smem:[%s4208_s0 + %s3670_s28]]  }
  0x4d   :  { %4245 = sst [smem:[#allocation32_spill]] %s3853_s12 }
  0x4e   :  { %80 = vsyncpa [#allocation3], 0 }
  0x4f   :  { %82 = vsyncpa [#allocation3 + $0x1], 0  ;;  %s3870_s7 = smov 0   ;;  %s3872_s10 = smov 0  }
  0x50   :  { %s3874_s11 = smov 0   ;;  %s3876_s15 = smov 0  }
  0x51 LB: > { %s4246_s14 = sld [smem:[#allocation10_spill]]  ;;  %s4247_s6 = sld [smem:[#allocation11_spill]]  ;;  %s3624_s10 = sphi %s3872_s10, %s4281_s10   ;;  %s3620_s7 = sphi %s3870_s7, %s4280_s7   ;;  %s3632_s15 = sphi %s3876_s15, %s4283_s15   ;;  %s3628_s11 = sphi %s3874_s11, %s4282_s11  }
  0x52   : > { %s3891_s0 = sadd.s32 4294967295, %s3632_s15   ;;  %s3045_s16 = sadd.s32 4294967294, %s3632_s15  }
  0x53   : > { %s3895_s18 = sadd.s32 1, %s3632_s15   ;;  %s877_s22 = sadd.s32 1, %s3628_s11 }
  0x54   : > { %s874_s23 = ssub.s32 %s3632_s15, %s3895_s18  ;;  %p887_p0 = scmp.ne.s32.totalorder %s3628_s11, %s3624_s10 }
  0x55   : > { %p875_p1 = scmp.eq.s32.totalorder %s874_s23, 0  ;;  %p888_p2 = scmp.eq.s32.totalorder %s3891_s0, 1 }
  0x56   : > { %p893_p3 = scmp.ne.s32.totalorder %s3624_s10, %s3620_s7  ;;  %p894_p4 = scmp.eq.s32.totalorder %s3045_s16, 1 }
  0x57   : > { %s3906_s26 = scalar_select %p875_p1, %s3628_s11, %s877_s22  }
  0x58   : > { %p3908_p5 = por %p888_p2, %p887_p0  ;;  %p3912_p6 = por %p894_p4, %p893_p3 }
  0x59   : > { %p3048_p7 = scmp.ge.s32.totalorder %s3632_s15, 1  ;;  %p1027_p8 = scmp.lt.s32.totalorder %s3632_s15, 3 }
  0x5b   : > { %p1028_p9 = pnand %p3048_p7, %p1027_p8 }
  0x5c   : > { %s4250_s5 = sld [smem:[#allocation5_spill]] (!%p1028_p9)  ;;  %p1118_p10 = scmp.lt.s32.totalorder (!%p1028_p9), %s3891_s0, 1  ;;  %vm1139_vm0 = vcmask (!%p1028_p9), 261120   ;;  %v1125_v7 = vld [vmem:[%s3698_s17] sm:$0xff] (!%p1028_p9)  ;;  %v1126_v8 = vld [vmem:[%s3698_s17 + $0x8] sm:$0xff] (!%p1028_p9)  ;;  %v1127_v9 = vld [vmem:[%s3698_s17 + $0x10] sm:$0xff] (!%p1028_p9) }
  0x5d   : > { %1031 = sbr.rel (%p1028_p9) target bundleno = 4002 (0xfa2), region = 168  ;;  %v3671_v10 = vmov (!%p1028_p9), 0.0|0.0   ;;  %v3366_v11 = vpack.c.bf16 (!%p1028_p9), %v1126_v8, %v1125_v7  ;;  %v1128_v12 = vld [vmem:[%s3698_s17 + $0x18] sm:$0xff] (!%p1028_p9)  ;;  %s4251_s9 = sld [smem:[#allocation6_spill]] (!%p1028_p9)  ;;  %vm3672_vm1 = vmmov (!%p1028_p9), 0   ;;  %v3673_v13 = vmov (!%p1028_p9), 0.0  }
  0x5e   : > { %3365 = vmatprep.subr.bf16.mxu1 (!%p1028_p9), %v3671_v10  ;;  %s4252_s13 = sld [smem:[#allocation7_spill]] (!%p1028_p9)  ;;  %3196 = vmatprep.mubr.msk.f32.mxu1 (!%p1028_p9), %vm3672_vm1, %v3673_v13  ;;  %v3369_v14 = vpack.c.bf16 (!%p1028_p9), %v1128_v12, %v1127_v9  ;;  %v1130_v24 = vld [vmem:[%s3708_s25] sm:$0xff] (!%p1028_p9)  ;;  %v1131_v25 = vld [vmem:[%s3708_s25 + $0x8] sm:$0xff] (!%p1028_p9)  ;;  %v1132_v27 = vld [vmem:[%s3708_s25 + $0x10] sm:$0xff] (!%p1028_p9)  ;;  %vm1260_vm2 = vcmask (!%p1028_p9), 523264   ;;  %s4253_s3 = sld [smem:[#allocation8_spill]] (!%p1028_p9) }
  0x5f   : > { %3383 = vmatprep.subr.bf16.mxu0 (!%p1028_p9), %v3671_v10  ;;  %3226 = vmatprep.mubr.msk.f32.mxu0 (!%p1028_p9), %vm3672_vm1, %v3673_v13  ;;  %v3372_v26 = vpack.c.bf16 (!%p1028_p9), %v1131_v25, %v1130_v24  ;;  %v1133_v28 = vld [vmem:[%s3708_s25 + $0x18] sm:$0xff] (!%p1028_p9)  ;;  %v1134_v30 = vld [vmem:[%s3708_s25 + $0x20] sm:$0xff] (!%p1028_p9)  ;;  %v1135_v31 = vld [vmem:[%s3708_s25 + $0x28] sm:$0xff] (!%p1028_p9)  ;;  %s4254_s8 = sld [smem:[#allocation9_spill]] (!%p1028_p9)  ;;  %s4255_s23 = sld [smem:[#allocation12_spill]] (!%p1028_p9)  ;;  %vm1700_vm13 = vcmask (!%p1028_p9), 64512  }
  0x60   : > { %3367 = vmatpush3.bf16.msra.mxu1 (!%p1028_p9), %v3366_v11  ;;  %v3375_v29 = vpack.c.bf16 (!%p1028_p9), %v1133_v28, %v1132_v27  ;;  %v3378_v32 = vpack.c.bf16 (!%p1028_p9), %v1135_v31, %v1134_v30  ;;  %v1136_v33 = vld [vmem:[%s3708_s25 + $0x30] sm:$0xff] (!%p1028_p9)  ;;  %v1137_v34 = vld [vmem:[%s3708_s25 + $0x38] sm:$0xff] (!%p1028_p9)  ;;  %v3053_v36 = vld [vmem:[%s3703_s21] ss:$0 sm:$0xff] (!%p1028_p9)  ;;  %s4279_s12 = sld [smem:[#allocation32_spill]] (!%p1028_p9) }
  0x61   : > { %3368 = vmatprep.subr.bf16.mxu1 (!%p1028_p9), %v3671_v10  ;;  %v3381_v35 = vpack.c.bf16 (!%p1028_p9), %v1137_v34, %v1136_v33  ;;  %v3056_v45 = vld [vmem:[%s3713_s29] ss:$0 sm:$0xff] (!%p1028_p9)  ;;  %v1339_v58 = vld [vmem:[%s4246_s14 + $0x8] sm:$0xff] (!%p1028_p9)  ;;  %v1340_v62 = vld [vmem:[%s4246_s14 + $0x10] sm:$0xff] (!%p1028_p9) }
  0x62   : > { %v1338_v57 = vld [vmem:[%s4246_s14] sm:$0xff] (!%p1028_p9)  ;;  %v1349_v61 = vld [vmem:[%s4247_s6 + $0x8] sm:$0xff] (!%p1028_p9)  ;;  %v1341_v63 = vld [vmem:[%s4246_s14 + $0x18] sm:$0xff] (!%p1028_p9) }
  0x63   : > { %v3051_v19 = vld [vmem:[%s4251_s9] ss:$0 sm:$0xff] (!%p1028_p9)  ;;  %v3384_v60 = vpack.c.bf16 (!%p1028_p9), %v1339_v58, %v1338_v57 }
  0x64   : > { %s1119_s2 = scalar_select %p1118_p10, %s3891_s0, 1  ;;  %3370 = vmatpush3.bf16.msra.mxu1 %v3369_v14  ;;  %v3052_v21 = vld [vmem:[%s4252_s13] ss:$0 sm:$0xff]  ;;  %v1344_v14 = vld [vmem:[%s3738_s24 + $0x8] sm:$0xff] }
  0x65   : > { %3371 = vmatprep.subr.bf16.mxu1 %v3671_v10  ;;  %v1348_v59 = vld [vmem:[%s4247_s6] sm:$0xff]  ;;  %3385 = vmatpush3.bf16.msra.mxu0 %v3384_v60 }
  0x66   : > { %s3050_s16 = sshll.u32 %s1119_s2, 3  ;;  %3386 = vmatprep.subr.bf16.mxu0 %v3671_v10  ;;  %v3058_v9 = vld [vmem:[%s4253_s3] ss:$0 sm:$0xff]  ;;  %s4260_s2 = sld [smem:[#allocation13_spill]] }
  0x67   : > { %s1121_s22 = scalar_lea.vmem %s4250_s5, %s3050_s16  ;;  %v1343_v12 = vld [vmem:[%s3738_s24] sm:$0xff]  ;;  %s4261_s16 = sld [smem:[#allocation14_spill]] }
  0x68   : > { %v3921_v0 = vld [vmem:[%s1121_s22] sm:$0xff]  ;;  %s4262_s22 = sld [smem:[#allocation17_spill]]  ;;  %s4266_s3 = sld [smem:[#allocation27_spill]] }
  0x69   : > { %v1140_v1 = vsel %vm1139_vm0, %v3921_v0, 0.0  ;;  %v3060_v28 = vld [vmem:[%s3733_s19] ss:$0 sm:$0xff]  ;;  %s4267_s5 = sld [smem:[#allocation20_spill]] }
  0x6a   : > { %1141 = vadd.xlane.f32.xlu0 %v1140_v1  ;;  %v1350_v1 = vld [vmem:[%s4247_s6 + $0x10] sm:$0xff]  ;;  %v3064_v34 = vld [vmem:[%s4255_s23] ss:$0 sm:$0xff]  ;;  %s4263_s23 = sld [smem:[#allocation18_spill]] }
  0xf7   : > { %v1142_v2 = vpop.xlane.xlu0 %1141 }
  0xf8   : > { %v1144_v3 = vmul.f32 0.03125, %v1142_v2  ;;  %v1351_v2 = vld [vmem:[%s4247_s6 + $0x18] sm:$0xff]  ;;  %s4270_s6 = sld [smem:[#allocation21_spill]] }
  0xfa   : > { %v1145_v4 = vsub.f32 %v3921_v0, %v1144_v3  ;;  %v3387_v3 = vpack.c.bf16 %v1341_v63, %v1340_v62 }
  0xfc   : > { %v1146_v5 = vmul.f32 %v1145_v4, %v1145_v4  ;;  %3388 = vmatpush3.bf16.msra.mxu0 %v3387_v3 }
  0xfd   : > { %3389 = vmatprep.subr.bf16.mxu0 %v3671_v10 }
  0xfe   : > { %v1147_v6 = vsel %vm1139_vm0, %v1146_v5, 0.0 }
  0xff   : > { %1148 = vadd.xlane.f32.xlu0 %v1147_v6 }
 0x18c   : > { %v1149_v15 = vpop.xlane.xlu0 %1148 }
 0x18d   : > { %v1150_v16 = vmul.f32 0.03125, %v1149_v15  ;;  %v3059_v15 = vld [vmem:[%s4254_s8] ss:$0 sm:$0xff]  ;;  %s4273_s8 = sld [smem:[#allocation23_spill]] }
 0x18f   : > { %v1151_v17 = vadd.f32 1e-05, %v1150_v16 }
 0x191   : > { %3528 = vrsqrt.f32 %v1151_v17  ;;  %v3390_v17 = vpack.c.bf16 %v1344_v14, %v1343_v12 }
 0x19b   : > { %v3529_v18 = vpop.eup %3528 }
 0x19c   : > { %v1153_v20 = vmul.f32 %v3529_v18, %v1145_v4  ;;  %v3399_v4 = vpack.c.bf16 %v1351_v2, %v1350_v1 }
 0x19e   : > { %v1160_v22 = vmul.f32 %v3051_v19, %v1153_v20  ;;  %v1345_v19 = vld [vmem:[%s3738_s24 + $0x10] sm:$0xff]  ;;  %v1346_v20 = vld [vmem:[%s3738_s24 + $0x18] sm:$0xff] }
 0x1a0   : > { %v1167_v23 = vadd.f32 %v3052_v21, %v1160_v22  ;;  %v3393_v21 = vpack.c.bf16 %v1346_v20, %v1345_v19  ;;  %v1616_v22 = vlaneseq  ;;  %v1355_v19 = vld [vmem:[%s4260_s2 + $0x10] sm:$0xff] }
 0x1a2   : > { %3197 = vmatmul.mubr.msk.f32.vlgmr.msra.gmra.mrb[0].mxu1 %vm1139_vm0, %v1167_v23  ;;  %v3998_v27 = vand.u32 127, %v1616_v22 }
 0x1a3   : > { %3215 = vmatprep.mubr.msk.f32.mxu1 %vm3672_vm1, %v3673_v13  ;;  %3373 = vmatpush3.bf16.msra.mxu1 %v3372_v26 }
 0x1a4   : > { %3374 = vmatprep.subr.bf16.mxu1 %v3671_v10  ;;  %vm1712_vm3 = vcmp.ge.s32.totalorder %v3998_v27, 8  ;;  %vm1713_vm4 = vcmp.lt.s32.totalorder %v3998_v27, 16  ;;  %vm1619_vm5 = vcmp.lt.s32.totalorder %v3998_v27, 8  ;;  %vm1948_vm7 = vcmp.ge.s32.totalorder %v3998_v27, 16 }
 0x1a5   : > { %vm1714_vm6 = vmand %vm1712_vm3, %vm1713_vm4  ;;  %vm1949_vm8 = vcmp.lt.s32.totalorder %v3998_v27, 24  ;;  %vm2112_vm10 = vcmp.ge.s32.totalorder %v3998_v27, 24  ;;  %vm2113_vm11 = vcmp.lt.s32.totalorder %v3998_v27, 32 }
 0x1a6   : > { %vm4018_vm9 = vmand %vm1948_vm7, %vm1949_vm8 }
 0x1a7   : > { %3376 = vmatpush3.bf16.msra.mxu1 %v3375_v29  ;;  %v3062_v29 = vld [vmem:[%s3743_s30] ss:$0 sm:$0xff]  ;;  %vm4035_vm12 = vmand %vm2112_vm10, %vm2113_vm11 }
 0x1a8   : > { %3377 = vmatprep.subr.bf16.mxu1 %v3671_v10 }
 0x1ab   : > { %3379 = vmatpush3.bf16.msra.mxu1 %v3378_v32 }
 0x1ac   : > { %3380 = vmatprep.subr.bf16.mxu1 %v3671_v10 }
 0x1af   : > { %3382 = vmatpush3.bf16.msra.mxu1 %v3381_v35 }
 0x1b0   : > { %3395 = vmatprep.subr.bf16.mxu1 %v3671_v10 }
 0x275   : > { %v1243_v37 = vpop.f32.mrb[0].mxu1 }
 0x276   : > { %v1244_v38 = vadd.f32 %v3053_v36, %v1243_v37  ;;  %v3198_v39 = vpop.f32.mrb[1].mxu1 }
 0x278   : > { %v3055_v40 = vmul.f32 -1.442695, %v1244_v38 }
 0x27a   : > { %3530 = vpow2.f32 %v3055_v40 }
 0x284   : > { %v3531_v41 = vpop.eup %3530 }
 0x285   : > { %v1250_v42 = vadd.f32 1.0, %v3531_v41 }
 0x287   : > { %3532 = vrcp.f32 %v1250_v42 }
 0x291   : > { %v3533_v43 = vpop.eup %3532 }
 0x292   : > { %v1253_v44 = vmul.f32 %v3533_v43, %v1244_v38 }
 0x294   : > { %3216 = vmatmul.mubr.msk.f32.vlgmr.msra.gmra.mrb[2].mxu1 %vm1260_vm2, %v1253_v44 }
 0x295   : > { %3248 = vmatprep.mubr.msk.f32.mxu1 %vm3672_vm1, %v3673_v13 }
 0x367   : > { %v1330_v46 = vpop.f32.mrb[2].mxu1 }
 0x368   : > { %v1331_v47 = vadd.f32 %v3056_v45, %v1330_v46  ;;  %v3217_v48 = vpop.f32.mrb[3].mxu1 }
 0x36a   : > { %v1334_v49 = vmul.f32 0.5, %v1331_v47 }
 0x36c   : > { %v3962_v50 = vadd.f32 %v1334_v49, %v3921_v0  ;;  %v3396_v0 = vpack.c.bf16 %v1349_v61, %v1348_v59 }
 0x36e   : > { %v1358_v51 = vsel %vm1139_vm0, %v3962_v50, 0.0  ;;  %3397 = vmatpush3.bf16.msra.mxu1 %v3396_v0 }
 0x36f   : > { %1359 = vadd.xlane.f32.xlu1 %v1358_v51  ;;  %3398 = vmatprep.subr.bf16.mxu1 %v3671_v10 }
 0x372   : > { %3400 = vmatpush3.bf16.msra.mxu1 %v3399_v4 }
 0x373   : > { %3256 = vmatprep.subr.mxu1 %v3673_v13 }
 0x3fc   : > { %v1360_v52 = vpop.xlane.xlu1 %1359 }
 0x3fd   : > { %v1361_v53 = vmul.f32 0.03125, %v1360_v52 }
 0x3ff   : > { %v1362_v54 = vsub.f32 %v3962_v50, %v1361_v53 }
 0x401   : > { %v1363_v55 = vmul.f32 %v1362_v54, %v1362_v54 }
 0x403   : > { %v1364_v56 = vsel %vm1139_vm0, %v1363_v55, 0.0 }
 0x404   : > { %1365 = vadd.xlane.f32.xlu1 %v1364_v56 }
 0x491   : > { %v1366_v5 = vpop.xlane.xlu1 %1365 }
 0x492   : > { %v1367_v6 = vmul.f32 0.03125, %v1366_v5 }
 0x494   : > { %v1368_v7 = vadd.f32 1e-05, %v1367_v6 }
 0x496   : > { %3534 = vrsqrt.f32 %v1368_v7 }
 0x4a0   : > { %v3535_v8 = vpop.eup %3534 }
 0x4a1   : > { %v1370_v11 = vmul.f32 %v3535_v8, %v1362_v54 }
 0x4a3   : > { %v1377_v16 = vmul.f32 %v3058_v9, %v1370_v11 }
 0x4a5   : > { %v1384_v18 = vadd.f32 %v3059_v15, %v1377_v16 }
 0x4a7   : > { %3227 = vmatmul.mubr.msk.f32.vlgmr.msra.gmra.mrb[0].mxu0 %vm1139_vm0, %v1384_v18  ;;  %3249 = vmatmul.mubr.msk.f32.vlgmr.msra.gmra.mrb[4].mxu1 %vm1139_vm0, %v1384_v18 }
 0x4a8   : > { %3391 = vmatpush3.bf16.msra.mxu0 %v3390_v17  ;;  %3237 = vmatprep.mubr.msk.f32.mxu0 %vm3672_vm1, %v3673_v13  ;;  %v1353_v17 = vld [vmem:[%s4260_s2] sm:$0xff] }
 0x4a9   : > { %3392 = vmatprep.subr.bf16.mxu0 %v3671_v10  ;;  %3258 = vmatprep.mubr.msk.f32.mxu1 %vm3672_vm1, %v3673_v13 }
 0x4ac   : > { %3394 = vmatpush3.bf16.msra.mxu0 %v3393_v21  ;;  %v1356_v21 = vld [vmem:[%s4260_s2 + $0x18] sm:$0xff] }
 0x4ad   : > { %3251 = vmatprep.subr.mxu0 %v3673_v13 }
 0x4af   : > { %3238 = vmatmul.mubr.msk.f32.vlgmr.msra.gmra.mrb[2].mxu0 %vm1139_vm0, %v1384_v18  ;;  %v1354_v18 = vld [vmem:[%s4260_s2 + $0x8] sm:$0xff]  ;;  %s4265_s2 = sld [smem:[#allocation16_spill]] }
 0x4b0   : > { %3253 = vmatprep.mubr.msk.f32.mxu0 %vm3672_vm1, %v3673_v13  ;;  %v3402_v20 = vpack.c.bf16 %v1354_v18, %v1353_v17 }
 0x57a   : > { %v1460_v23 = vpop.f32.mrb[0].mxu0  ;;  %v1612_v24 = vpop.f32.mrb[4].mxu1 }
 0x57b   : > { %v3228_v25 = vpop.f32.mrb[1].mxu0  ;;  %v3250_v26 = vpop.f32.mrb[5].mxu1  ;;  %v1461_v31 = vadd.f32 %v3060_v28, %v1460_v23  ;;  %v4012_v35 = vadd.f32 %v3064_v34, %v1612_v24  ;;  %v3405_v23 = vpack.c.bf16 %v1356_v21, %v1355_v19 }
 0x57d   : > { %v1621_v36 = vsel %vm1619_vm5, %v1461_v31, 0.0  ;;  %v1715_v37 = vsel %vm1714_vm6, %v1461_v31, 0.0  ;;  %v1951_v39 = vsel %vm4018_vm9, %v1461_v31, 0.0  ;;  %v2115_v41 = vsel %vm4035_vm12, %v1461_v31, 0.0 }
 0x582   : > { %v1536_v30 = vpop.f32.mrb[2].mxu0 }
 0x583   : > { %v1537_v32 = vadd.f32 %v3062_v29, %v1536_v30  ;;  %v3239_v33 = vpop.f32.mrb[3].mxu0 }
 0x585   : > { %3252 = vmatpush3.xpose.msk.msra.mxu0 %vm1139_vm0, %v1537_v32  ;;  %3257 = vmatpush3.xpose.msk.msra.mxu1 %vm1139_vm0, %v1537_v32 }
 0x586   : > { %3261 = vmatprep.subr.mxu0 %v3673_v13  ;;  %3271 = vmatprep.subr.mxu1 %v3673_v13 }
 0x588   : > { %3254 = vmatmul.mubr.msk.f32.vlgmr.msra.gmra.mrb[4].mxu0 %vm1139_vm0, %v1621_v36  ;;  %3259 = vmatmul.mubr.msk.f32.vlgmr.msra.gmra.mrb[6].mxu1 %vm1139_vm0, %v1715_v37 }
 0x589   : > { %3262 = vmatpush3.msk.msra.mxu0 %vm1714_vm6, %v4012_v35  ;;  %3272 = vmatpush3.xpose.msk.msra.mxu1 %vm1139_vm0, %v1537_v32 }
 0x58a   : > { %3273 = vmatprep.mubr.msk.f32.mxu1 %vm3672_vm1, %v3673_v13  ;;  %3281 = vmatprep.subr.mxu1 %v3673_v13 }
 0x58b   : > { %3263 = vmatprep.mubr.msk.f32.mxu0 %vm3672_vm1, %v3673_v13  ;;  %3266 = vmatprep.subr.mxu0 %v3673_v13 }
 0x58c   : > { %3274 = vmatmul.mubr.msk.f32.vlgmr.msra.gmra.mrb[8].mxu1 %vm1139_vm0, %v1951_v39 }
 0x58d   : > { %3282 = vmatpush3.xpose.msk.msra.mxu1 %vm1139_vm0, %v1537_v32  ;;  %3283 = vmatprep.mubr.msk.f32.mxu1 %vm3672_vm1, %v3673_v13 }
 0x58e   : > { %3401 = vmatprep.subr.bf16.mxu1 %v3671_v10 }
 0x590   : > { %3284 = vmatmul.mubr.msk.f32.vlgmr.msra.gmra.mrb[10].mxu1 %vm1139_vm0, %v2115_v41 }
 0x591   : > { %3299 = vmatprep.mubr.msk.f32.mxu1 %vm3672_vm1, %v3673_v13  ;;  %3403 = vmatpush3.bf16.msra.mxu1 %v3402_v20 }
 0x592   : > { %3404 = vmatprep.subr.bf16.mxu1 %v3671_v10 }
 0x595   : > { %3406 = vmatpush3.bf16.msra.mxu1 %v3405_v23 }
 0x596   : > { %3413 = vmatprep.subr.bf16.mxu1 %v3671_v10 }
 0x65b   : > { %v1695_v42 = vpop.f32.mrb[4].mxu0  ;;  %v1786_v43 = vpop.f32.mrb[6].mxu1 }
 0x65c   : > { %v1699_v44 = vmul.f32 0.35355338, %v1695_v42  ;;  %v1790_v45 = vmul.f32 0.35355338, %v1786_v43  ;;  %v3255_v46 = vpop.f32.mrb[5].mxu0  ;;  %v3260_v47 = vpop.f32.mrb[7].mxu1 }
 0x65e   : > { %v1701_v48 = vsel %vm1700_vm13, %v1699_v44, -inf  ;;  %v1791_v49 = vsel %vm1700_vm13, %v1790_v45, -inf }
 0x65f   : > { %1702 = vmax.xlane.f32.xlu1 %v1701_v48  ;;  %1792 = vmax.xlane.f32.xlu0 %v1791_v49  ;;  %v2022_v51 = vpop.f32.mrb[8].mxu1  ;;  %v2358_v49 = vld [vmem:[%s4262_s22] sm:$0xff] }
 0x660   : > { %v2026_v52 = vmul.f32 0.35355338, %v2022_v51  ;;  %v3275_v53 = vpop.f32.mrb[9].mxu1  ;;  %v2359_v51 = vld [vmem:[%s4262_s22 + $0x8] sm:$0xff] }
 0x661   : > { %v2363_v53 = vld [vmem:[%s4263_s23 + $0x8] sm:$0xff] }
 0x662   : > { %v2027_v54 = vsel %vm1700_vm13, %v2026_v52, -inf }
 0x663   : > { %2028 = vmax.xlane.f32.xlu0 %v2027_v54  ;;  %v2186_v55 = vpop.f32.mrb[10].mxu1 }
 0x664   : > { %v2190_v56 = vmul.f32 0.35355338, %v2186_v55  ;;  %v3285_v57 = vpop.f32.mrb[11].mxu1  ;;  %v2360_v55 = vld [vmem:[%s4262_s22 + $0x10] sm:$0xff] }
 0x665   : > { %v2364_v57 = vld [vmem:[%s4263_s23 + $0x10] sm:$0xff] }
 0x666   : > { %v2191_v58 = vsel %vm1700_vm13, %v2190_v56, -inf }
 0x667   : > { %2192 = vmax.xlane.f32.xlu1 %v2191_v58 }
 0x6ec   : > { %v1703_v59 = vpop.xlane.xlu1 %1702  ;;  %v1793_v60 = vpop.xlane.xlu0 %1792 }
 0x6ed   : > { %v1704_v61 = vsub.f32 %v1699_v44, %v1703_v59  ;;  %v1794_v62 = vsub.f32 %v1790_v45, %v1793_v60  ;;  %v2365_v59 = vld [vmem:[%s4263_s23 + $0x18] sm:$0xff] }
 0x6ee   : > { %v3417_v60 = vpack.c.bf16 %v2365_v59, %v2364_v57 }
 0x6ef   : > { %v1705_v63 = vmul.f32 1.442695, %v1704_v61  ;;  %v1795_v0 = vmul.f32 1.442695, %v1794_v62 }
 0x6f0   : > { %v2029_v1 = vpop.xlane.xlu0 %2028 }
 0x6f1   : > { %3536 = vpow2.f32 %v1705_v63  ;;  %v2030_v2 = vsub.f32 %v2026_v52, %v2029_v1  ;;  %v3408_v52 = vpack.c.bf16 %v2359_v51, %v2358_v49 }
 0x6f2   : > { %3538 = vpow2.f32 %v1795_v0 }
 0x6f3   : > { %v2031_v3 = vmul.f32 1.442695, %v2030_v2 }
 0x6f4   : > { %v2193_v4 = vpop.xlane.xlu1 %2192 }
 0x6f5   : > { %3540 = vpow2.f32 %v2031_v3  ;;  %v2194_v5 = vsub.f32 %v2190_v56, %v2193_v4  ;;  %v2361_v56 = vld [vmem:[%s4262_s22 + $0x18] sm:$0xff]  ;;  %v3085_v3 = vld [vmem:[%s4265_s2] ss:$0 sm:$0xff]  ;;  %s4268_s2 = sld [smem:[#allocation26_spill]] }
 0x6f6   : > { %v3411_v58 = vpack.c.bf16 %v2361_v56, %v2360_v55 }
 0x6f7   : > { %v2195_v6 = vmul.f32 1.442695, %v2194_v5 }
 0x6f9   : > { %3542 = vpow2.f32 %v2195_v6  ;;  %v2374_v6 = vld [vmem:[%s4266_s3] sm:$0xff] }
 0x6fb   : > { %v3537_v7 = vpop.eup %3536 }
 0x6fc   : > { %v3539_v8 = vpop.eup %3538  ;;  %v1707_v9 = vsel %vm1700_vm13, %v3537_v7, 0.0 }
 0x6fd   : > { %v1797_v11 = vsel %vm1700_vm13, %v3539_v8, 0.0  ;;  %1708 = vadd.xlane.f32.xlu1 %v1707_v9 }
 0x6fe   : > { %1798 = vadd.xlane.f32.xlu0 %v1797_v11  ;;  %v2377_v11 = vld [vmem:[%s4266_s3 + $0x18] sm:$0xff] }
 0x6ff   : > { %v3541_v12 = vpop.eup %3540 }
 0x700   : > { %v2033_v14 = vsel %vm1700_vm13, %v3541_v12, 0.0 }
 0x702   : > { %2034 = vadd.xlane.f32.xlu0 %v2033_v14  ;;  %v3088_v14 = vld [vmem:[%s4267_s5] ss:$0 sm:$0xff]  ;;  %s4271_s5 = sld [smem:[#allocation22_spill]] }
 0x703   : > { %v3543_v15 = vpop.eup %3542 }
 0x704   : > { %v2197_v16 = vsel %vm1700_vm13, %v3543_v15, 0.0 }
 0x705   : > { %2198 = vadd.xlane.f32.xlu1 %v2197_v16 }
 0x78a   : > { %v1709_v25 = vpop.xlane.xlu1 %1708 }
 0x78b   : > { %v1799_v24 = vpop.xlane.xlu0 %1798 }
 0x78c   : > { %3544 = vrcp.f32 %v1799_v24  ;;  %v2569_v24 = vshrl.u32 %v1616_v22, 7 }
 0x78d   : > { %3546 = vrcp.f32 %v1709_v25  ;;  %v2373_v25 = vld [vmem:[%s4268_s2] sm:$0x1]  ;;  %s4274_s2 = sld [smem:[#allocation24_spill]] }
 0x78e   : > { %vm2570_vm14 = vcmp.ge.s32.totalorder %v2569_v24, 1  ;;  %vm2577_vm15 = vcmp.le.s32.totalorder %v2569_v24, 6 }
 0x78f   : > { %v2035_v29 = vpop.xlane.xlu0 %2034 }
 0x790   : > { %3548 = vrcp.f32 %v2035_v29 }
 0x792   : > { %v2199_v32 = vpop.xlane.xlu1 %2198 }
 0x793   : > { %3550 = vrcp.f32 %v2199_v32  ;;  %v2585_v32 = vsub.s32 0, %v2569_v24  ;;  %v3094_v55 = vld [vmem:[%s4274_s2] ss:$0 sm:$0xff] }
 0x796   : > { %v3545_v26 = vpop.eup %3544 }
 0x797   : > { %v1801_v28 = vmul.f32 %v3545_v26, %v3539_v8  ;;  %v3547_v30 = vpop.eup %3546  ;;  %v2376_v8 = vld [vmem:[%s4266_s3 + $0x10] sm:$0xff]  ;;  %v2590_v26 = vsub.s32 1, %v2569_v24 }
 0x798   : > { %v1711_v31 = vmul.f32 %v3547_v30, %v3537_v7  ;;  %v2375_v7 = vld [vmem:[%s4266_s3 + $0x8] sm:$0xff]  ;;  %v2368_v30 = vld [vmem:[%s4270_s6] sm:$0x7]  ;;  %s4272_s3 = sld [smem:[#allocation25_spill]]  ;;  %s4275_s6 = sld [smem:[#allocation28_spill]] }
 0x799   : > { %3264 = vmatmul.mubr.msk.f32.vlgmr.msra.gmra.mrb[6].mxu0 %vm1700_vm13, %v1801_v28  ;;  %v3420_v9 = vpack.c.bf16 %v2375_v7, %v2374_v6  ;;  %v2614_v28 = vadd.f32 1e-05, %v2373_v25 }
 0x79a   : > { %3267 = vmatpush3.msk.msra.mxu0 %vm1619_vm5, %v4012_v35  ;;  %3268 = vmatprep.mubr.msk.f32.mxu0 %vm3672_vm1, %v3673_v13  ;;  %v3549_v27 = vpop.eup %3548 }
 0x79b   : > { %3276 = vmatprep.subr.mxu0 %v3673_v13  ;;  %v2037_v33 = vmul.f32 %v3549_v27, %v3541_v12  ;;  %v3423_v12 = vpack.c.bf16 %v2377_v11, %v2376_v8 }
 0x79d   : > { %v3551_v34 = vpop.eup %3550 }
 0x79e   : > { %v2201_v36 = vmul.f32 %v3551_v34, %v3543_v15  ;;  %v3092_v49 = vld [vmem:[%s4272_s3] ss:$0 sm:$0xff]  ;;  %s4277_s3 = sld [smem:[#allocation29_spill]] }
 0x7a1   : > { %3269 = vmatmul.mubr.msk.f32.vlgmr.msra.gmra.mrb[6].mxu0 %vm1700_vm13, %v1711_v31  ;;  %v2596_v31 = vsub.s32 2, %v2569_v24 }
 0x7a2   : > { %3277 = vmatpush3.msk.msra.mxu0 %vm4018_vm9, %v4012_v35  ;;  %3278 = vmatprep.mubr.msk.f32.mxu0 %vm3672_vm1, %v3673_v13 }
 0x7a3   : > { %3286 = vmatprep.subr.mxu0 %v3673_v13 }
 0x7a9   : > { %3279 = vmatmul.mubr.msk.f32.vlgmr.msra.gmra.mrb[6].mxu0 %vm1700_vm13, %v2037_v33  ;;  %v2591_v33 = vrot.slane %v2368_v30, %v2590_v26  ;;  %v2731_v26 = vld [vmem:[%s3858_s20] sm:$0xff] }
 0x7aa   : > { %3287 = vmatpush3.msk.msra.mxu0 %vm4035_vm12, %v4012_v35  ;;  %3288 = vmatprep.mubr.msk.f32.mxu0 %vm3672_vm1, %v3673_v13  ;;  %v3082_v35 = vld [vmem:[%s4261_s16] ss:$0 sm:$0xff]  ;;  %s4264_s16 = sld [smem:[#allocation15_spill]] }
 0x7ab   : > { %3407 = vmatprep.subr.bf16.mxu0 %v3671_v10 }
 0x7b0   : > { %v3084_v1 = vld [vmem:[%s4264_s16] ss:$0 sm:$0xff]  ;;  %s4269_s16 = sld [smem:[#allocation19_spill]] }
 0x7b1   : > { %3289 = vmatmul.mubr.msk.f32.vlgmr.msra.gmra.mrb[6].mxu0 %vm1700_vm13, %v2201_v36 }
 0x7b2   : > { %3310 = vmatprep.mubr.msk.f32.mxu0 %vm3672_vm1, %v3673_v13  ;;  %3409 = vmatpush3.bf16.msra.mxu0 %v3408_v52 }
 0x7b3   : > { %3410 = vmatprep.subr.bf16.mxu0 %v3671_v10 }
 0x7b6   : > { %3412 = vmatpush3.bf16.msra.mxu0 %v3411_v58  ;;  %v3086_v29 = vld [vmem:[%s4269_s16] ss:$0 sm:$0xff]  ;;  %s4276_s16 = sld [smem:[#allocation31_spill]] }
 0x7b7   : > { %3419 = vmatprep.subr.bf16.mxu0 %v3671_v10 }
 0x7bc   : > { %v2727_v11 = vld [vmem:[%s4276_s16 + $0x8] sm:$0xff] }
 0x884   : > { %v2271_v37 = vpop.f32.mrb[6].mxu0 }
 0x885   : > { %v3290_v38 = vpop.f32.mrb[7].mxu0  ;;  %3300 = vmatmul.mubr.msk.f32.vlgmr.msra.gmra.mrb[12].mxu1 %vm1139_vm0, %v2271_v37  ;;  %v2597_v37 = vrot.slane %v2368_v30, %v2596_v31  ;;  %v2734_v31 = vld [vmem:[%s3858_s20 + $0x18] sm:$0xff] }
 0x886   : > { %3321 = vmatprep.mubr.msk.f32.mxu1 %vm3672_vm1, %v3673_v13  ;;  %v2586_v38 = vrot.slane %v2368_v30, %v2585_v32  ;;  %v2733_v30 = vld [vmem:[%s3858_s20 + $0x10] sm:$0xff] }
 0x958   : > { %v2351_v39 = vpop.f32.mrb[12].mxu1 }
 0x959   : > { %v2352_v40 = vadd.f32 %v3082_v35, %v2351_v39  ;;  %v3301_v41 = vpop.f32.mrb[13].mxu1 }
 0x95b   : > { %v4091_v42 = vadd.f32 %v2352_v40, %v3962_v50  ;;  %v2362_v50 = vld [vmem:[%s4263_s23] sm:$0xff] }
 0x95c   : > { %v3414_v54 = vpack.c.bf16 %v2363_v53, %v2362_v50  ;;  %v3093_v53 = vld [vmem:[%s4273_s8] ss:$0 sm:$0xff]  ;;  %s4278_s8 = sld [smem:[#allocation30_spill]] }
 0x95d   : > { %v2379_v43 = vsel %vm1139_vm0, %v4091_v42, 0.0 }
 0x95e   : > { %2380 = vadd.xlane.f32.xlu0 %v2379_v43  ;;  %3415 = vmatpush3.bf16.msra.mxu1 %v3414_v54 }
 0x95f   : > { %3416 = vmatprep.subr.bf16.mxu1 %v3671_v10 }
 0x962   : > { %3418 = vmatpush3.bf16.msra.mxu1 %v3417_v60 }
 0x963   : > { %3425 = vmatprep.subr.bf16.mxu1 %v3671_v10 }
 0x9eb   : > { %v2381_v44 = vpop.xlane.xlu0 %2380 }
 0x9ec   : > { %v2382_v45 = vmul.f32 0.03125, %v2381_v44 }
 0x9ee   : > { %v2383_v46 = vsub.f32 %v4091_v42, %v2382_v45 }
 0x9f0   : > { %v2384_v47 = vmul.f32 %v2383_v46, %v2383_v46 }
 0x9f2   : > { %v2385_v48 = vsel %vm1139_vm0, %v2384_v47, 0.0  ;;  %v3091_v47 = vld [vmem:[%s4271_s5] ss:$0 sm:$0xff]  ;;  %s1115_s5 = sand.u32 1, %s3624_s10  }
 0x9f3   : > { %2386 = vadd.xlane.f32.xlu1 %v2385_v48  ;;  %s3049_s2 = sshll.u32 %s1115_s5, 3 }
 0xa80   : > { %v2387_v61 = vpop.xlane.xlu1 %2386 }
 0xa81   : > { %v2388_v62 = vmul.f32 0.03125, %v2387_v61 }
 0xa83   : > { %v2389_v63 = vadd.f32 1e-05, %v2388_v62 }
 0xa85   : > { %3552 = vrsqrt.f32 %v2389_v63  ;;  %v3096_v63 = vld [vmem:[%s4275_s6] ss:$0 sm:$0xff]  ;;  %s3106_s6 = sshll.u32 %s3891_s0, 7  ;;  %s3674_s0 = smov [#allocation2]  }
 0xa86   : > { %s4169_s9 = scalar_lea.hbm %s3868_s4, %s3106_s6 }
 0xa8f   : > { %v3553_v0 = vpop.eup %3552 }
 0xa90   : > { %v2391_v2 = vmul.f32 %v3553_v0, %v2383_v46 }
 0xa92   : > { %v2398_v4 = vmul.f32 %v3084_v1, %v2391_v2 }
 0xa94   : > { %v2405_v5 = vadd.f32 %v3085_v3, %v2398_v4 }
 0xa96   : > { %3311 = vmatmul.mubr.msk.f32.vlgmr.msra.gmra.mrb[8].mxu0 %vm1139_vm0, %v2405_v5  ;;  %3322 = vmatmul.mubr.msk.f32.vlgmr.msra.gmra.mrb[14].mxu1 %vm1139_vm0, %v2405_v5 }
 0xa97   : > { %3332 = vmatprep.mubr.msk.f32.mxu0 %vm3672_vm1, %v3673_v13  ;;  %3343 = vmatprep.mubr.msk.f32.mxu1 %vm3672_vm1, %v3673_v13 }
 0xa98   : > { %3421 = vmatpush3.bf16.msra.mxu0 %v3420_v9  ;;  %v2726_v9 = vld [vmem:[%s4276_s16] sm:$0xff] }
 0xa99   : > { %3422 = vmatprep.subr.bf16.mxu0 %v3671_v10 }
 0xa9c   : > { %3424 = vmatpush3.bf16.msra.mxu0 %v3423_v12  ;;  %v3426_v12 = vpack.c.bf16 %v2727_v11, %v2726_v9 }
 0xa9d   : > { %3431 = vmatprep.subr.bf16.mxu0 %v3671_v10 }
 0xa9e   : > { %3427 = vmatpush3.bf16.msra.mxu1 %v3426_v12 }
 0xa9f   : > { %3428 = vmatprep.subr.bf16.mxu1 %v3671_v10 }
 0xb69   : > { %v2481_v15 = vpop.f32.mrb[8].mxu0  ;;  %v2557_v16 = vpop.f32.mrb[14].mxu1 }
 0xb6a   : > { %v2558_v17 = vadd.f32 %v3088_v14, %v2557_v16  ;;  %v3312_v18 = vpop.f32.mrb[9].mxu0  ;;  %v3323_v19 = vpop.f32.mrb[15].mxu1  ;;  %v2482_v27 = vadd.f32 %v3086_v29, %v2481_v15  ;;  %v2729_v14 = vld [vmem:[%s4276_s16 + $0x18] sm:$0xff] }
 0xb6c   : > { %v3090_v20 = vmul.f32 -1.442695, %v2558_v17 }
 0xb6e   : > { %3554 = vpow2.f32 %v3090_v20  ;;  %v3098_v20 = vld [vmem:[%s4277_s3] ss:$0 sm:$0xff]  ;;  %s1117_s3 = scalar_lea.vmem [#allocation2], %s3049_s2  ;;  %s3574_s2 = sshll.u32 %s3674_s0, 4  ;;  %s3575_s2 = int_to_ptr.vmem [resolvable:$false] %s3574_s2 }
 0xb6f   : > { %s3576_s14 = scalar_lea.vmem %s3575_s2, 256 }
 0xb78   : > { %v3555_v21 = vpop.eup %3554 }
 0xb79   : > { %v2564_v23 = vadd.f32 1.0, %v3555_v21 }
 0xb7b   : > { %3556 = vrcp.f32 %v2564_v23  ;;  %v3099_v23 = vld [vmem:[%s4278_s8] ss:$0 sm:$0xff]  ;;  %s2949_s8 = sshll.u32 %s1117_s3, 4  ;;  %s4171_s8 = int_to_ptr.vmem [resolvable:$true] %s2949_s8 }
 0xb7c   : > { %3558 = vrsqrt.f32 %v2614_v28  ;;  %v2732_v28 = vld [vmem:[%s3858_s20 + $0x8] sm:$0xff]  ;;  %s3570_s13 = scalar_lea.vmem %s4171_s8, 128  ;;  %p3577_p0 = scmp.lt.s32.totalorder %s4171_s8, %s3575_s2 }
 0xb7d   : > { %v3432_v29 = vpack.c.bf16 %v2732_v28, %v2731_v26  ;;  %p3571_p11 = scmp.ne.s32.totalorder %s4171_s8, %s3570_s13  ;;  %p3578_p1 = scmp.lt.s32.totalorder %s3576_s14, %s3570_s13 }
 0xb7f   : > { %p3572_p12 = pnand %p3571_p11, %p3908_p5  ;;  %p3579_p2 = por %p3578_p1, %p3577_p0 }
 0xb81   : > { %p3573_p13 = pneg %p3572_p12 }
 0xb83   : > { %p3580_p3 = pnand %p3579_p2, %p3573_p13 }
 0xb85   : > { %v3557_v34 = vpop.eup %3556 }
 0xb86   : > { %v2567_v36 = vmul.f32 %v3557_v34, %v2482_v27  ;;  %v3559_v46 = vpop.eup %3558  ;;  %v2735_v27 = vld [vmem:[%s3858_s20 + $0x20] sm:$0xff] }
 0xb87   : > { %v2620_v50 = vrot.slane %v3559_v46, %v2585_v32  ;;  %v3435_v32 = vpack.c.bf16 %v2734_v31, %v2733_v30 }
 0xb88   : > { %v2572_v22 = vrot.slane %v2567_v36, 7  ;;  %v2578_v35 = vrot.slane %v2567_v36, 1  ;;  %v2592_v39 = vmul.f32 %v2591_v33, %v2567_v36  ;;  %v2736_v33 = vld [vmem:[%s3858_s20 + $0x28] sm:$0xff]  ;;  %v2737_v36 = vld [vmem:[%s3858_s20 + $0x30] sm:$0xff] }
 0xb89   : > { %v3438_v34 = vpack.c.bf16 %v2736_v33, %v2735_v27 }
 0xb8a   : > { %v2576_v40 = vsel %vm2570_vm14, %v2572_v22, 0.0  ;;  %v2582_v41 = vsel %vm2577_vm15, %v2578_v35, 0.0  ;;  %v3100_v22 = vld [vmem:[%s4279_s12] ss:$0 sm:$0xff]  ;;  %s2936_s12 = scalar_lea.sflag [#allocation3], %s1115_s5 }
 0xb8b   : > { %v2598_v43 = vmul.f32 %v2597_v37, %v2582_v41  ;;  %v2587_v44 = vmul.f32 %v2586_v38, %v2576_v40  ;;  %v2738_v37 = vld [vmem:[%s3858_s20 + $0x38] sm:$0xff] }
 0xb8c   : > { %v3441_v38 = vpack.c.bf16 %v2738_v37, %v2737_v36 }
 0xb8d   : > { %v2593_v45 = vadd.f32 %v2592_v39, %v2587_v44 }
 0xb8f   : > { %v2599_v48 = vadd.f32 %v2598_v43, %v2593_v45 }
 0xb91   : > { %v2606_v51 = vadd.f32 %v3091_v47, %v2599_v48 }
 0xb93   : > { %v2613_v52 = vsub.f32 %v2606_v51, %v3092_v49 }
 0xb95   : > { %v2622_v54 = vmul.f32 %v2620_v50, %v2613_v52 }
 0xb97   : > { %v2629_v56 = vmul.f32 %v3093_v53, %v2622_v54 }
 0xb99   : > { %v2636_v57 = vadd.f32 %v3094_v55, %v2629_v56 }
 0xb9b   : > { %v3095_v58 = vmul.f32 -1.442695, %v2636_v57 }
 0xb9d   : > { %3560 = vpow2.f32 %v3095_v58 }
 0xba7   : > { %v3561_v59 = vpop.eup %3560 }
 0xba8   : > { %v2640_v60 = vadd.f32 1.0, %v3561_v59 }
 0xbaa   : > { %3562 = vrcp.f32 %v2640_v60 }
 0xbb4   : > { %v3563_v61 = vpop.eup %3562 }
 0xbb5   : > { %v2643_v62 = vmul.f32 %v3563_v61, %v2636_v57 }
 0xbb7   : > { %3333 = vmatmul.mubr.msk.f32.vlgmr.msra.gmra.mrb[10].mxu0 %vm1139_vm0, %v2643_v62 }
 0xbb8   : > { %3362 = vmatprep.mubr.msk.f32.mxu0 %vm3672_vm1, %v3673_v13  ;;  %3433 = vmatpush3.bf16.msra.mxu0 %v3432_v29 }
 0xbb9   : > { %3434 = vmatprep.subr.bf16.mxu0 %v3671_v10 }
 0xbbc   : > { %3436 = vmatpush3.bf16.msra.mxu0 %v3435_v32 }
 0xbbd   : > { %3437 = vmatprep.subr.bf16.mxu0 %v3671_v10 }
 0xbc0   : > { %3439 = vmatpush3.bf16.msra.mxu0 %v3438_v34 }
 0xbc1   : > { %3440 = vmatprep.subr.bf16.mxu0 %v3671_v10  ;;  %v3103_v10 = vld [vmem:[%s3863_s27] ss:$0 sm:$0xff] }
 0xbc4   : > { %3442 = vmatpush3.bf16.msra.mxu0 %v3441_v38 }
 0xc8a   : > { %v2719_v0 = vpop.f32.mrb[10].mxu0 }
 0xc8b   : > { %v2720_v1 = vadd.f32 %v3096_v63, %v2719_v0  ;;  %v3334_v2 = vpop.f32.mrb[11].mxu0 }
 0xc8d   : > { %v4137_v3 = vadd.f32 %v2720_v1, %v4091_v42  ;;  %v2728_v42 = vld [vmem:[%s4276_s16 + $0x10] sm:$0xff] }
 0xc8e   : > { %v3429_v15 = vpack.c.bf16 %v2729_v14, %v2728_v42 }
 0xc8f   : > { %v2740_v4 = vsel %vm1139_vm0, %v4137_v3, 0.0 }
 0xc90   : > { %2741 = vadd.xlane.f32.xlu0 %v2740_v4  ;;  %3430 = vmatpush3.bf16.msra.mxu1 %v3429_v15 }
 0xd1d   : > { %v2742_v5 = vpop.xlane.xlu0 %2741 }
 0xd1e   : > { %v2743_v6 = vmul.f32 0.03125, %v2742_v5 }
 0xd20   : > { %v2744_v7 = vsub.f32 %v4137_v3, %v2743_v6 }
 0xd22   : > { %v2745_v8 = vmul.f32 %v2744_v7, %v2744_v7 }
 0xd24   : > { %v2746_v13 = vsel %vm1139_vm0, %v2745_v8, 0.0 }
 0xd25   : > { %2747 = vadd.xlane.f32.xlu1 %v2746_v13 }
 0xdb2   : > { %v2748_v16 = vpop.xlane.xlu1 %2747 }
 0xdb3   : > { %v2749_v17 = vmul.f32 0.03125, %v2748_v16 }
 0xdb5   : > { %v2750_v18 = vadd.f32 1e-05, %v2749_v17 }
 0xdb7   : > { %3564 = vrsqrt.f32 %v2750_v18 }
 0xdc1   : > { %v3565_v19 = vpop.eup %3564 }
 0xdc2   : > { %v2752_v21 = vmul.f32 %v3565_v19, %v2744_v7 }
 0xdc4   : > { %v2759_v24 = vmul.f32 %v3098_v20, %v2752_v21 }
 0xdc6   : > { %v2766_v25 = vadd.f32 %v3099_v23, %v2759_v24 }
 0xdc8   : > { %3344 = vmatmul.mubr.msk.f32.vlgmr.msra.gmra.mrb[16].mxu1 %vm1139_vm0, %v2766_v25 }
 0xe9b   : > { %v2842_v35 = vpop.f32.mrb[16].mxu1 }
 0xe9c   : > { %v2843_v39 = vadd.f32 %v3100_v22, %v2842_v35  ;;  %v3345_v40 = vpop.f32.mrb[17].mxu1 }
 0xe9e   : > { %v3102_v41 = vmul.f32 -1.442695, %v2843_v39 }
 0xea0   : > { %3566 = vpow2.f32 %v3102_v41 }
 0xeaa   : > { %v3567_v43 = vpop.eup %3566 }
 0xeab   : > { %v2849_v44 = vadd.f32 1.0, %v3567_v43 }
 0xead   : > { %3568 = vrcp.f32 %v2849_v44 }
 0xeb7   : > { %v3569_v45 = vpop.eup %3568 }
 0xeb8   : > { %v2852_v46 = vmul.f32 %v3569_v45, %v2843_v39 }
 0xeba   : > { %3363 = vmatmul.mubr.msk.f32.vlgmr.msra.gmra.mrb[12].mxu0 %vm1260_vm2, %v2852_v46 }
 0xf8d   : > { %v2928_v47 = vpop.f32.mrb[12].mxu0 }
 0xf8e   : > { %v2929_v48 = vadd.f32 %v3103_v10, %v2928_v47  ;;  %v3364_v49 = vpop.f32.mrb[13].mxu0 }
 0xf90   : > { %v2932_v51 = vmul.f32 0.5, %v2929_v48 }
 0xf92   : > { %v2933_v50 = vadd.f32 %v2932_v51, %v4137_v3 }
 0xf94   : > { %2934 = vst.msk [vmem:[%s1117_s3] sm:$0xff] %vm1139_vm0, %v2933_v50 }
 0xf95   : > { %3583 = shalt.err (!%p3580_p3)
}
 0xf96   : > { %s3584_s5 = scalar_lea.hbm %s4169_s9, 128  ;;  %s3588_s6 = scalar_lea.hbm %s3868_s4, 256 }
 0xf97   : > { %p3585_p4 = scmp.ne.s32.totalorder %s4169_s9, %s3584_s5  ;;  %p3589_p9 = scmp.lt.u32.totalorder %s4169_s9, %s3868_s4 }
 0xf98   : > { %p3590_p10 = scmp.lt.u32.totalorder %s3588_s6, %s3584_s5  ;;  %p3592_p12 = scmp.lt.u32.totalorder %s3584_s5, %s4169_s9 }
 0xf99   : > { %p3586_p7 = pnand %p3585_p4, %p3908_p5 }
 0xf9a   : > { %p3591_p11 = por %p3590_p10, %p3589_p9 }
 0xf9b   : > { %p3587_p8 = pneg %p3586_p7 }
 0xf9c   : > { %p3593_p0 = por %p3592_p12, %p3591_p11 }
 0xf9e   : > { %p3594_p13 = pnand %p3593_p0, %p3587_p8 }
 0xfa0   : > { %3597 = shalt.err (!%p3594_p13)
}
 0xfa1   : > { %3449 = dma.vmem_to_hbm [thread:$0]  (%p3908_p5), %s4171_s8, 128, %s4169_s9, %s2936_s12  }
 0xfa2 PF: > { %p3455_p1 = scmp.ge.s32.totalorder %s3632_s15, 2  ;;  %s2961_s13 = sand.u32 1, %s3620_s7  }
 0xfa3   : > { %s2962_s14 = scalar_lea.sflag [#allocation3], %s2961_s13 }
 0xfa4   : > { %p3452_p2 = pnand %p3455_p1, %p3912_p6 }
 0xfa6   : > { %3615 = dma.done.wait (!%p3452_p2), %s2962_s14, 128  }
 0xfa7   : > { %3617 = vsyncadd (!%p3452_p2), %s2962_s14, 4294967168  ;;  %p85_p3 = scmp.ge.s32.totalorder %s3895_s18, 4   ;;  %s4280_s7 = smov %s3624_s10 }
 0xfa8   : > { %s4281_s10 = smov %s3628_s11  ;;  %s4282_s11 = smov %s3906_s26 }
 0xfa9   : > { %s4283_s15 = smov %s3895_s18  ;;  %87 = sbr.rel (!%p85_p3) target bundleno = 81 (0x51), region = 240 }
 0xfb0   :  { %2967 = vsyncpa [#allocation3], 1 }
 0xfb1   :  { %2969 = vsyncpa [#allocation3 + $0x1], 1 }

</bundles_post_ra>
